<compile_context>
chip_gen: v6e
topology: v6e:2x2x1
jax: 0.10.0
libtpu: 0.0.40
codegen_flags: <defaults>
</compile_context>

<pallas_src>
import functools

import jax
import jax.numpy as jnp
import numpy as np
from jax import lax
from jax.experimental import pallas as pl
from jax.experimental.pallas import tpu as pltpu

BN_EPS = 1e-3  # PyTorch module uses eps=0.001


def _down_kernel(xps_ref, w_ref, b_ref, y_ref, stat_ref, *, TH, WO, Cin, Cc):
    """Fused 5x5/stride-2 conv + 2x2 max-pool + channel concat + BN partial sums.

    xps_ref : (4, Hp2, Wp2, Cin)  parity planes of the zero-padded image,
              plane p = 2*r + s holds xpad[2i+r, 2j+s, :].
    w_ref   : (25*Cin, Cc)        conv weight, flattened [kh][kw][ci] x [co].
    b_ref   : (1, Cc)             conv bias.
    y_ref   : (TH, WO, C)         pre-BN output rows of this tile (C = Cc+Cin).
    stat_ref: (2, C)              per-(image, row-tile) sum / sum-of-squares.
    """
    t = pl.program_id(1)
    row0 = pl.multiple_of(t * TH, TH)          # first output row of this tile

    # ---- build the im2col slab: all 25 taps, lane-concatenated ----
    # out[i,j] uses xpad[2i+kh, 2j+kw]; with kh=2a+r, kw=2c_+s this is a
    # contiguous slice of parity plane (r, s):  plane[i+a, j+c_].
    taps = []
    for kh in range(5):
        a, r = divmod(kh, 2)
        for kw in range(5):
            c_, s = divmod(kw, 2)
            taps.append(xps_ref[2 * r + s, pl.ds(row0 + a, TH), c_:c_ + WO, :])
    slab = jnp.concatenate(taps, axis=-1)       # (TH, WO, 25*Cin)

    # ---- single MXU matmul, K = 25*Cin, f32 accumulation ----
    conv = jnp.einsum("hwc,cd->hwd", slab, w_ref[...],
                      preferred_element_type=jnp.float32)
    conv = conv + b_ref[...].reshape(1, 1, Cc)  # (TH, WO, Cc)

    # ---- 2x2 stride-2 max-pool of the *unpadded* input ----
    # x[2i+r, 2j+s] == xpad[2(i+1)+r, 2(j+1)+s] == plane(r,s)[i+1, j+1]
    pool = xps_ref[0, pl.ds(row0 + 1, TH), 1:1 + WO, :]
    for p in (1, 2, 3):
        pool = jnp.maximum(pool, xps_ref[p, pl.ds(row0 + 1, TH), 1:1 + WO, :])

    # ---- channel "concat" done as two sub-slice stores (conv first, pool second) ----
    y_ref[:, :, :Cc] = conv
    y_ref[:, :, Cc:] = pool

    # ---- BatchNorm partial statistics for this (image, row-tile) block ----
    cs = jnp.sum(conv, axis=(0, 1)).reshape(1, Cc)
    ps = jnp.sum(pool, axis=(0, 1)).reshape(1, Cin)
    cq = jnp.sum(conv * conv, axis=(0, 1)).reshape(1, Cc)
    pq = jnp.sum(pool * pool, axis=(0, 1)).reshape(1, Cin)
    stat_ref[0:1, :] = jnp.concatenate([cs, ps], axis=-1)   # per-channel sum
    stat_ref[1:2, :] = jnp.concatenate([cq, pq], axis=-1)   # per-channel sum^2


def downsampler_block5(x_nchw, w_hwio, b, gamma, beta, *, block_rows=None):
    """DownsamplerBlock5 forward.  x_nchw: (N, Cin, H, W) -> (N, Cout, H/2, W/2).

    block_rows: optional tile size over the output height (bounds per-step VMEM;
    use e.g. 64-128 for large images / v7x).  Must divide H//2.
    """
    N, Cin, H, W = x_nchw.shape
    KH, KW, _, Cc = w_hwio.shape
    C = Cc + Cin                 # = noutput
    assert H % 2 == 0 and W % 2 == 0, "module requires even spatial dims"
    HO, WO = H // 2, W // 2
    TH = HO if block_rows is None else min(block_rows, HO)
    assert HO % TH == 0, "block_rows must divide H//2"
    T = HO // TH
    Hp2, Wp2 = HO + 2, WO + 2    # parity-plane spatial extents of the padded image

    # --- glue (one XLA pass over the input): pad NCHW, then a single transpose
    #     producing the channels-last 2x2 parity planes (no NHWC intermediate) ---
    xpad = jnp.pad(x_nchw.astype(jnp.float32), ((0, 0), (0, 0), (2, 2), (2, 2)))
    xps = (xpad.reshape(N, Cin, Hp2, 2, Wp2, 2)
               .transpose(0, 3, 5, 2, 4, 1)        # (N, r, s, i, j, c)
               .reshape(N, 4, Hp2, Wp2, Cin))      # plane index = 2*r + s

    w_flat = w_hwio.astype(jnp.float32).reshape(KH * KW * Cin, Cc)
    b2 = b.astype(jnp.float32).reshape(1, Cc)

    kernel = functools.partial(_down_kernel, TH=TH, WO=WO, Cin=Cin, Cc=Cc)
    y, stats = pl.pallas_call(
        kernel,
        grid=(N, T),
        in_specs=[
            # whole-image parity planes; same block for every row-tile step, so
            # the pipeline does not re-DMA it while n is unchanged.
            pl.BlockSpec((None, 4, Hp2, Wp2, Cin), lambda n, t: (n, 0, 0, 0, 0)),
            pl.BlockSpec((KH * KW * Cin, Cc), lambda n, t: (0, 0)),
            pl.BlockSpec((1, Cc), lambda n, t: (0, 0)),
        ],
        out_specs=[
            pl.BlockSpec((None, TH, WO, C), lambda n, t: (n, t, 0, 0)),
            pl.BlockSpec((None, None, 2, C), lambda n, t: (n, t, 0, 0)),
        ],
        out_shape=[
            jax.ShapeDtypeStruct((N, HO, WO, C), jnp.float32),
            jax.ShapeDtypeStruct((N, T, 2, C), jnp.float32),
        ],
        # Every grid step writes disjoint blocks (no resident accumulator), so
        # both axes are safely "parallel" (v7x: shardable across both TCs).
        compiler_params=pltpu.CompilerParams(
            dimension_semantics=("parallel", "parallel")),
    )(xps, w_flat, b2)

    # --- BN (training-mode: batch stats, biased var) + ReLU, fused by XLA into
    #     the already-required channels-last -> NCHW transpose (single pass) ---
    count = float(N * HO * WO)
    tot = jnp.sum(stats, axis=(0, 1))                    # (2, C)
    mean = tot[0] / count
    var = tot[1] / count - mean * mean
    scale = gamma.astype(jnp.float32) * lax.rsqrt(var + BN_EPS)
    shift = beta.astype(jnp.float32) - mean * scale
    out = jnp.maximum(y * scale + shift, 0.0)            # (N, HO, WO, C)
    return jnp.transpose(out, (0, 3, 1, 2))              # NCHW


def _reference(x_nchw, w_hwio, b, gamma, beta):
    """Pure-JAX reference mirroring the PyTorch forward (training-mode BN)."""
    w_oihw = jnp.transpose(w_hwio, (3, 2, 0, 1))
    conv = lax.conv_general_dilated(
        x_nchw, w_oihw, window_strides=(2, 2), padding=((2, 2), (2, 2)),
        dimension_numbers=("NCHW", "OIHW", "NCHW"))
    conv = conv + b.reshape(1, -1, 1, 1)
    pool = lax.reduce_window(x_nchw, -jnp.inf, lax.max,
                             (1, 1, 2, 2), (1, 1, 2, 2), "VALID")
    y = jnp.concatenate([conv, pool], axis=1)
    mean = y.mean(axis=(0, 2, 3), keepdims=True)
    var = y.var(axis=(0, 2, 3), keepdims=True)        # biased, like BN training
    yn = (y - mean) / jnp.sqrt(var + BN_EPS)
    out = yn * gamma.reshape(1, -1, 1, 1) + beta.reshape(1, -1, 1, 1)
    return jnp.maximum(out, 0.0)


if __name__ == "__main__":
    key = jax.random.PRNGKey(0)
    k1, k2, k3, k4, k5 = jax.random.split(key, 5)

    # Small shapes consistent with the module: ninput=4, noutput=8
    N, Cin, H, W = 2, 4, 16, 16
    Cout = 8
    Cc = Cout - Cin

    x = jax.random.normal(k1, (N, Cin, H, W), jnp.float32)
    w_hwio = jax.random.normal(k2, (5, 5, Cin, Cc), jnp.float32) * 0.1
    b = jax.random.normal(k3, (Cc,), jnp.float32) * 0.1
    gamma = jax.random.uniform(k4, (Cout,), jnp.float32, minval=0.5, maxval=1.5)
    beta = jax.random.normal(k5, (Cout,), jnp.float32) * 0.1

    out = downsampler_block5(x, w_hwio, b, gamma, beta)
    out = jax.block_until_ready(out)
    assert out.shape == (N, Cout, H // 2, W // 2)

    ref = _reference(x, w_hwio, b, gamma, beta)
    np.testing.assert_allclose(np.asarray(out), np.asarray(ref),
                               rtol=1e-3, atol=1e-3)
    print("KERNEL_OK")
</pallas_src>

<mosaic_0001>
module attributes {stable_mosaic.version = 11 : i64} {
  func.func @_down_kernel(%arg0: i32, %arg1: i32, %arg2: memref<1x4x10x10x4xf32, #tpu.memory_space<vmem>>, %arg3: memref<100x4xf32, #tpu.memory_space<vmem>>, %arg4: memref<1x4xf32, #tpu.memory_space<vmem>>, %arg5: memref<1x8x8x8xf32, #tpu.memory_space<vmem>>, %arg6: memref<1x1x2x8xf32, #tpu.memory_space<vmem>>) attributes {dimension_semantics = [#tpu.dimension_semantics<parallel>, #tpu.dimension_semantics<parallel>], iteration_bounds = array<i64: 2, 1>, scalar_prefetch = 0 : i64, scratch_operands = 0 : i64, tpu.core_type = #tpu.core_type<tc>, window_params = [{transform_indices = @transform_0, window_bounds = array<i64: 1, 4, 10, 10, 4>}, {pipeline_mode = #tpu.pipeline_mode<synchronous>, transform_indices = @transform_1, window_bounds = array<i64: 100, 4>}, {pipeline_mode = #tpu.pipeline_mode<synchronous>, transform_indices = @transform_2, window_bounds = array<i64: 1, 4>}, {transform_indices = @transform_3, window_bounds = array<i64: 1, 8, 8, 8>}, {transform_indices = @transform_4, window_bounds = array<i64: 1, 1, 2, 8>}]} {
    %c8_i32 = arith.constant 8 : i32
    %0 = arith.muli %arg1, %c8_i32 : i32
    %1 = tpu.assume_multiple %0, 8 : i32
    %c0_i32 = arith.constant 0 : i32
    %2 = arith.addi %1, %c0_i32 : i32
    %c0 = arith.constant 0 : index
    %c0_0 = arith.constant 0 : index
    %3 = arith.index_cast %2 : i32 to index
    %c0_1 = arith.constant 0 : index
    %c0_2 = arith.constant 0 : index
    %4 = vector.load %arg2[%c0, %c0_0, %3, %c0_1, %c0_2] : memref<1x4x10x10x4xf32, #tpu.memory_space<vmem>>, vector<1x1x8x8x4xf32>
    %5 = vector.shape_cast %4 : vector<1x1x8x8x4xf32> to vector<8x8x4xf32>
    %c0_i32_3 = arith.constant 0 : i32
    %6 = arith.addi %1, %c0_i32_3 : i32
    %c0_4 = arith.constant 0 : index
    %c1 = arith.constant 1 : index
    %7 = arith.index_cast %6 : i32 to index
    %c0_5 = arith.constant 0 : index
    %c0_6 = arith.constant 0 : index
    %8 = vector.load %arg2[%c0_4, %c1, %7, %c0_5, %c0_6] : memref<1x4x10x10x4xf32, #tpu.memory_space<vmem>>, vector<1x1x8x8x4xf32>
    %9 = vector.shape_cast %8 : vector<1x1x8x8x4xf32> to vector<8x8x4xf32>
    %c0_i32_7 = arith.constant 0 : i32
    %10 = arith.addi %1, %c0_i32_7 : i32
    %c0_8 = arith.constant 0 : index
    %c0_9 = arith.constant 0 : index
    %11 = arith.index_cast %10 : i32 to index
    %c1_10 = arith.constant 1 : index
    %c0_11 = arith.constant 0 : index
    %12 = vector.load %arg2[%c0_8, %c0_9, %11, %c1_10, %c0_11] : memref<1x4x10x10x4xf32, #tpu.memory_space<vmem>>, vector<1x1x8x8x4xf32>
    %13 = vector.shape_cast %12 : vector<1x1x8x8x4xf32> to vector<8x8x4xf32>
    %c0_i32_12 = arith.constant 0 : i32
    %14 = arith.addi %1, %c0_i32_12 : i32
    %c0_13 = arith.constant 0 : index
    %c1_14 = arith.constant 1 : index
    %15 = arith.index_cast %14 : i32 to index
    %c1_15 = arith.constant 1 : index
    %c0_16 = arith.constant 0 : index
    %16 = vector.load %arg2[%c0_13, %c1_14, %15, %c1_15, %c0_16] : memref<1x4x10x10x4xf32, #tpu.memory_space<vmem>>, vector<1x1x8x8x4xf32>
    %17 = vector.shape_cast %16 : vector<1x1x8x8x4xf32> to vector<8x8x4xf32>
    %c0_i32_17 = arith.constant 0 : i32
    %18 = arith.addi %1, %c0_i32_17 : i32
    %c0_18 = arith.constant 0 : index
    %c0_19 = arith.constant 0 : index
    %19 = arith.index_cast %18 : i32 to index
    %c2 = arith.constant 2 : index
    %c0_20 = arith.constant 0 : index
    %20 = vector.load %arg2[%c0_18, %c0_19, %19, %c2, %c0_20] : memref<1x4x10x10x4xf32, #tpu.memory_space<vmem>>, vector<1x1x8x8x4xf32>
    %21 = vector.shape_cast %20 : vector<1x1x8x8x4xf32> to vector<8x8x4xf32>
    %c0_i32_21 = arith.constant 0 : i32
    %22 = arith.addi %1, %c0_i32_21 : i32
    %c0_22 = arith.constant 0 : index
    %c2_23 = arith.constant 2 : index
    %23 = arith.index_cast %22 : i32 to index
    %c0_24 = arith.constant 0 : index
    %c0_25 = arith.constant 0 : index
    %24 = vector.load %arg2[%c0_22, %c2_23, %23, %c0_24, %c0_25] : memref<1x4x10x10x4xf32, #tpu.memory_space<vmem>>, vector<1x1x8x8x4xf32>
    %25 = vector.shape_cast %24 : vector<1x1x8x8x4xf32> to vector<8x8x4xf32>
    %c0_i32_26 = arith.constant 0 : i32
    %26 = arith.addi %1, %c0_i32_26 : i32
    %c0_27 = arith.constant 0 : index
    %c3 = arith.constant 3 : index
    %27 = arith.index_cast %26 : i32 to index
    %c0_28 = arith.constant 0 : index
    %c0_29 = arith.constant 0 : index
    %28 = vector.load %arg2[%c0_27, %c3, %27, %c0_28, %c0_29] : memref<1x4x10x10x4xf32, #tpu.memory_space<vmem>>, vector<1x1x8x8x4xf32>
    %29 = vector.shape_cast %28 : vector<1x1x8x8x4xf32> to vector<8x8x4xf32>
    %c0_i32_30 = arith.constant 0 : i32
    %30 = arith.addi %1, %c0_i32_30 : i32
    %c0_31 = arith.constant 0 : index
    %c2_32 = arith.constant 2 : index
    %31 = arith.index_cast %30 : i32 to index
    %c1_33 = arith.constant 1 : index
    %c0_34 = arith.constant 0 : index
    %32 = vector.load %arg2[%c0_31, %c2_32, %31, %c1_33, %c0_34] : memref<1x4x10x10x4xf32, #tpu.memory_space<vmem>>, vector<1x1x8x8x4xf32>
    %33 = vector.shape_cast %32 : vector<1x1x8x8x4xf32> to vector<8x8x4xf32>
    %c0_i32_35 = arith.constant 0 : i32
    %34 = arith.addi %1, %c0_i32_35 : i32
    %c0_36 = arith.constant 0 : index
    %c3_37 = arith.constant 3 : index
    %35 = arith.index_cast %34 : i32 to index
    %c1_38 = arith.constant 1 : index
    %c0_39 = arith.constant 0 : index
    %36 = vector.load %arg2[%c0_36, %c3_37, %35, %c1_38, %c0_39] : memref<1x4x10x10x4xf32, #tpu.memory_space<vmem>>, vector<1x1x8x8x4xf32>
    %37 = vector.shape_cast %36 : vector<1x1x8x8x4xf32> to vector<8x8x4xf32>
    %c0_i32_40 = arith.constant 0 : i32
    %38 = arith.addi %1, %c0_i32_40 : i32
    %c0_41 = arith.constant 0 : index
    %c2_42 = arith.constant 2 : index
    %39 = arith.index_cast %38 : i32 to index
    %c2_43 = arith.constant 2 : index
    %c0_44 = arith.constant 0 : index
    %40 = vector.load %arg2[%c0_41, %c2_42, %39, %c2_43, %c0_44] : memref<1x4x10x10x4xf32, #tpu.memory_space<vmem>>, vector<1x1x8x8x4xf32>
    %41 = vector.shape_cast %40 : vector<1x1x8x8x4xf32> to vector<8x8x4xf32>
    %c1_i32 = arith.constant 1 : i32
    %42 = arith.addi %1, %c1_i32 : i32
    %c0_45 = arith.constant 0 : index
    %c0_46 = arith.constant 0 : index
    %43 = arith.index_cast %42 : i32 to index
    %c0_47 = arith.constant 0 : index
    %c0_48 = arith.constant 0 : index
    %44 = vector.load %arg2[%c0_45, %c0_46, %43, %c0_47, %c0_48] : memref<1x4x10x10x4xf32, #tpu.memory_space<vmem>>, vector<1x1x8x8x4xf32>
    %45 = vector.shape_cast %44 : vector<1x1x8x8x4xf32> to vector<8x8x4xf32>
    %c1_i32_49 = arith.constant 1 : i32
    %46 = arith.addi %1, %c1_i32_49 : i32
    %c0_50 = arith.constant 0 : index
    %c1_51 = arith.constant 1 : index
    %47 = arith.index_cast %46 : i32 to index
    %c0_52 = arith.constant 0 : index
    %c0_53 = arith.constant 0 : index
    %48 = vector.load %arg2[%c0_50, %c1_51, %47, %c0_52, %c0_53] : memref<1x4x10x10x4xf32, #tpu.memory_space<vmem>>, vector<1x1x8x8x4xf32>
    %49 = vector.shape_cast %48 : vector<1x1x8x8x4xf32> to vector<8x8x4xf32>
    %c1_i32_54 = arith.constant 1 : i32
    %50 = arith.addi %1, %c1_i32_54 : i32
    %c0_55 = arith.constant 0 : index
    %c0_56 = arith.constant 0 : index
    %51 = arith.index_cast %50 : i32 to index
    %c1_57 = arith.constant 1 : index
    %c0_58 = arith.constant 0 : index
    %52 = vector.load %arg2[%c0_55, %c0_56, %51, %c1_57, %c0_58] : memref<1x4x10x10x4xf32, #tpu.memory_space<vmem>>, vector<1x1x8x8x4xf32>
    %53 = vector.shape_cast %52 : vector<1x1x8x8x4xf32> to vector<8x8x4xf32>
    %c1_i32_59 = arith.constant 1 : i32
    %54 = arith.addi %1, %c1_i32_59 : i32
    %c0_60 = arith.constant 0 : index
    %c1_61 = arith.constant 1 : index
    %55 = arith.index_cast %54 : i32 to index
    %c1_62 = arith.constant 1 : index
    %c0_63 = arith.constant 0 : index
    %56 = vector.load %arg2[%c0_60, %c1_61, %55, %c1_62, %c0_63] : memref<1x4x10x10x4xf32, #tpu.memory_space<vmem>>, vector<1x1x8x8x4xf32>
    %57 = vector.shape_cast %56 : vector<1x1x8x8x4xf32> to vector<8x8x4xf32>
    %c1_i32_64 = arith.constant 1 : i32
    %58 = arith.addi %1, %c1_i32_64 : i32
    %c0_65 = arith.constant 0 : index
    %c0_66 = arith.constant 0 : index
    %59 = arith.index_cast %58 : i32 to index
    %c2_67 = arith.constant 2 : index
    %c0_68 = arith.constant 0 : index
    %60 = vector.load %arg2[%c0_65, %c0_66, %59, %c2_67, %c0_68] : memref<1x4x10x10x4xf32, #tpu.memory_space<vmem>>, vector<1x1x8x8x4xf32>
    %61 = vector.shape_cast %60 : vector<1x1x8x8x4xf32> to vector<8x8x4xf32>
    %c1_i32_69 = arith.constant 1 : i32
    %62 = arith.addi %1, %c1_i32_69 : i32
    %c0_70 = arith.constant 0 : index
    %c2_71 = arith.constant 2 : index
    %63 = arith.index_cast %62 : i32 to index
    %c0_72 = arith.constant 0 : index
    %c0_73 = arith.constant 0 : index
    %64 = vector.load %arg2[%c0_70, %c2_71, %63, %c0_72, %c0_73] : memref<1x4x10x10x4xf32, #tpu.memory_space<vmem>>, vector<1x1x8x8x4xf32>
    %65 = vector.shape_cast %64 : vector<1x1x8x8x4xf32> to vector<8x8x4xf32>
    %c1_i32_74 = arith.constant 1 : i32
    %66 = arith.addi %1, %c1_i32_74 : i32
    %c0_75 = arith.constant 0 : index
    %c3_76 = arith.constant 3 : index
    %67 = arith.index_cast %66 : i32 to index
    %c0_77 = arith.constant 0 : index
    %c0_78 = arith.constant 0 : index
    %68 = vector.load %arg2[%c0_75, %c3_76, %67, %c0_77, %c0_78] : memref<1x4x10x10x4xf32, #tpu.memory_space<vmem>>, vector<1x1x8x8x4xf32>
    %69 = vector.shape_cast %68 : vector<1x1x8x8x4xf32> to vector<8x8x4xf32>
    %c1_i32_79 = arith.constant 1 : i32
    %70 = arith.addi %1, %c1_i32_79 : i32
    %c0_80 = arith.constant 0 : index
    %c2_81 = arith.constant 2 : index
    %71 = arith.index_cast %70 : i32 to index
    %c1_82 = arith.constant 1 : index
    %c0_83 = arith.constant 0 : index
    %72 = vector.load %arg2[%c0_80, %c2_81, %71, %c1_82, %c0_83] : memref<1x4x10x10x4xf32, #tpu.memory_space<vmem>>, vector<1x1x8x8x4xf32>
    %73 = vector.shape_cast %72 : vector<1x1x8x8x4xf32> to vector<8x8x4xf32>
    %c1_i32_84 = arith.constant 1 : i32
    %74 = arith.addi %1, %c1_i32_84 : i32
    %c0_85 = arith.constant 0 : index
    %c3_86 = arith.constant 3 : index
    %75 = arith.index_cast %74 : i32 to index
    %c1_87 = arith.constant 1 : index
    %c0_88 = arith.constant 0 : index
    %76 = vector.load %arg2[%c0_85, %c3_86, %75, %c1_87, %c0_88] : memref<1x4x10x10x4xf32, #tpu.memory_space<vmem>>, vector<1x1x8x8x4xf32>
    %77 = vector.shape_cast %76 : vector<1x1x8x8x4xf32> to vector<8x8x4xf32>
    %c1_i32_89 = arith.constant 1 : i32
    %78 = arith.addi %1, %c1_i32_89 : i32
    %c0_90 = arith.constant 0 : index
    %c2_91 = arith.constant 2 : index
    %79 = arith.index_cast %78 : i32 to index
    %c2_92 = arith.constant 2 : index
    %c0_93 = arith.constant 0 : index
    %80 = vector.load %arg2[%c0_90, %c2_91, %79, %c2_92, %c0_93] : memref<1x4x10x10x4xf32, #tpu.memory_space<vmem>>, vector<1x1x8x8x4xf32>
    %81 = vector.shape_cast %80 : vector<1x1x8x8x4xf32> to vector<8x8x4xf32>
    %c2_i32 = arith.constant 2 : i32
    %82 = arith.addi %1, %c2_i32 : i32
    %c0_94 = arith.constant 0 : index
    %c0_95 = arith.constant 0 : index
    %83 = arith.index_cast %82 : i32 to index
    %c0_96 = arith.constant 0 : index
    %c0_97 = arith.constant 0 : index
    %84 = vector.load %arg2[%c0_94, %c0_95, %83, %c0_96, %c0_97] : memref<1x4x10x10x4xf32, #tpu.memory_space<vmem>>, vector<1x1x8x8x4xf32>
    %85 = vector.shape_cast %84 : vector<1x1x8x8x4xf32> to vector<8x8x4xf32>
    %c2_i32_98 = arith.constant 2 : i32
    %86 = arith.addi %1, %c2_i32_98 : i32
    %c0_99 = arith.constant 0 : index
    %c1_100 = arith.constant 1 : index
    %87 = arith.index_cast %86 : i32 to index
    %c0_101 = arith.constant 0 : index
    %c0_102 = arith.constant 0 : index
    %88 = vector.load %arg2[%c0_99, %c1_100, %87, %c0_101, %c0_102] : memref<1x4x10x10x4xf32, #tpu.memory_space<vmem>>, vector<1x1x8x8x4xf32>
    %89 = vector.shape_cast %88 : vector<1x1x8x8x4xf32> to vector<8x8x4xf32>
    %c2_i32_103 = arith.constant 2 : i32
    %90 = arith.addi %1, %c2_i32_103 : i32
    %c0_104 = arith.constant 0 : index
    %c0_105 = arith.constant 0 : index
    %91 = arith.index_cast %90 : i32 to index
    %c1_106 = arith.constant 1 : index
    %c0_107 = arith.constant 0 : index
    %92 = vector.load %arg2[%c0_104, %c0_105, %91, %c1_106, %c0_107] : memref<1x4x10x10x4xf32, #tpu.memory_space<vmem>>, vector<1x1x8x8x4xf32>
    %93 = vector.shape_cast %92 : vector<1x1x8x8x4xf32> to vector<8x8x4xf32>
    %c2_i32_108 = arith.constant 2 : i32
    %94 = arith.addi %1, %c2_i32_108 : i32
    %c0_109 = arith.constant 0 : index
    %c1_110 = arith.constant 1 : index
    %95 = arith.index_cast %94 : i32 to index
    %c1_111 = arith.constant 1 : index
    %c0_112 = arith.constant 0 : index
    %96 = vector.load %arg2[%c0_109, %c1_110, %95, %c1_111, %c0_112] : memref<1x4x10x10x4xf32, #tpu.memory_space<vmem>>, vector<1x1x8x8x4xf32>
    %97 = vector.shape_cast %96 : vector<1x1x8x8x4xf32> to vector<8x8x4xf32>
    %c2_i32_113 = arith.constant 2 : i32
    %98 = arith.addi %1, %c2_i32_113 : i32
    %c0_114 = arith.constant 0 : index
    %c0_115 = arith.constant 0 : index
    %99 = arith.index_cast %98 : i32 to index
    %c2_116 = arith.constant 2 : index
    %c0_117 = arith.constant 0 : index
    %100 = vector.load %arg2[%c0_114, %c0_115, %99, %c2_116, %c0_117] : memref<1x4x10x10x4xf32, #tpu.memory_space<vmem>>, vector<1x1x8x8x4xf32>
    %101 = vector.shape_cast %100 : vector<1x1x8x8x4xf32> to vector<8x8x4xf32>
    %102 = tpu.concatenate %5, %9, %13, %17, %21, %25, %29, %33, %37, %41, %45, %49, %53, %57, %61, %65 in 2 : vector<8x8x4xf32>, vector<8x8x4xf32>, vector<8x8x4xf32>, vector<8x8x4xf32>, vector<8x8x4xf32>, vector<8x8x4xf32>, vector<8x8x4xf32>, vector<8x8x4xf32>, vector<8x8x4xf32>, vector<8x8x4xf32>, vector<8x8x4xf32>, vector<8x8x4xf32>, vector<8x8x4xf32>, vector<8x8x4xf32>, vector<8x8x4xf32>, vector<8x8x4xf32> -> vector<8x8x64xf32>
    %103 = tpu.concatenate %69, %73, %77, %81, %85, %89, %93, %97, %101 in 2 : vector<8x8x4xf32>, vector<8x8x4xf32>, vector<8x8x4xf32>, vector<8x8x4xf32>, vector<8x8x4xf32>, vector<8x8x4xf32>, vector<8x8x4xf32>, vector<8x8x4xf32>, vector<8x8x4xf32> -> vector<8x8x36xf32>
    %104 = tpu.concatenate %102, %103 in 2 : vector<8x8x64xf32>, vector<8x8x36xf32> -> vector<8x8x100xf32>
    %c0_118 = arith.constant 0 : index
    %c0_119 = arith.constant 0 : index
    %105 = vector.load %arg3[%c0_118, %c0_119] : memref<100x4xf32, #tpu.memory_space<vmem>>, vector<100x4xf32>
    "tpu.trace_start"() <{level = 10 : i32, message = "hwc,cd->hwd"}> : () -> ()
    %cst = arith.constant dense<0.000000e+00> : vector<8x8x4xf32>
    %106 = tpu.matmul %104, %105, %cst {dimension_numbers = #tpu.dot_dimension_numbers<[2], [0], [0, 1], [1], [0, 0, 0, 1, 1, 1], [], []>} : vector<8x8x100xf32>, vector<100x4xf32>, vector<8x8x4xf32> -> vector<8x8x4xf32>
    "tpu.trace_stop"() : () -> ()
    %c0_120 = arith.constant 0 : index
    %c0_121 = arith.constant 0 : index
    %107 = vector.load %arg4[%c0_120, %c0_121] : memref<1x4xf32, #tpu.memory_space<vmem>>, vector<1x4xf32>
    %108 = vector.shape_cast %107 : vector<1x4xf32> to vector<1x1x4xf32>
    %109 = vector.broadcast %108 : vector<1x1x4xf32> to vector<8x8x4xf32>
    %110 = arith.addf %106, %109 : vector<8x8x4xf32>
    %c1_i32_122 = arith.constant 1 : i32
    %111 = arith.addi %1, %c1_i32_122 : i32
    %c0_123 = arith.constant 0 : index
    %c0_124 = arith.constant 0 : index
    %112 = arith.index_cast %111 : i32 to index
    %c1_125 = arith.constant 1 : index
    %c0_126 = arith.constant 0 : index
    %113 = vector.load %arg2[%c0_123, %c0_124, %112, %c1_125, %c0_126] : memref<1x4x10x10x4xf32, #tpu.memory_space<vmem>>, vector<1x1x8x8x4xf32>
    %114 = vector.shape_cast %113 : vector<1x1x8x8x4xf32> to vector<8x8x4xf32>
    %c1_i32_127 = arith.constant 1 : i32
    %115 = arith.addi %1, %c1_i32_127 : i32
    %c0_128 = arith.constant 0 : index
    %c1_129 = arith.constant 1 : index
    %116 = arith.index_cast %115 : i32 to index
    %c1_130 = arith.constant 1 : index
    %c0_131 = arith.constant 0 : index
    %117 = vector.load %arg2[%c0_128, %c1_129, %116, %c1_130, %c0_131] : memref<1x4x10x10x4xf32, #tpu.memory_space<vmem>>, vector<1x1x8x8x4xf32>
    %118 = vector.shape_cast %117 : vector<1x1x8x8x4xf32> to vector<8x8x4xf32>
    %119 = arith.maximumf %114, %118 : vector<8x8x4xf32>
    %c1_i32_132 = arith.constant 1 : i32
    %120 = arith.addi %1, %c1_i32_132 : i32
    %c0_133 = arith.constant 0 : index
    %c2_134 = arith.constant 2 : index
    %121 = arith.index_cast %120 : i32 to index
    %c1_135 = arith.constant 1 : index
    %c0_136 = arith.constant 0 : index
    %122 = vector.load %arg2[%c0_133, %c2_134, %121, %c1_135, %c0_136] : memref<1x4x10x10x4xf32, #tpu.memory_space<vmem>>, vector<1x1x8x8x4xf32>
    %123 = vector.shape_cast %122 : vector<1x1x8x8x4xf32> to vector<8x8x4xf32>
    %124 = arith.maximumf %119, %123 : vector<8x8x4xf32>
    %c1_i32_137 = arith.constant 1 : i32
    %125 = arith.addi %1, %c1_i32_137 : i32
    %c0_138 = arith.constant 0 : index
    %c3_139 = arith.constant 3 : index
    %126 = arith.index_cast %125 : i32 to index
    %c1_140 = arith.constant 1 : index
    %c0_141 = arith.constant 0 : index
    %127 = vector.load %arg2[%c0_138, %c3_139, %126, %c1_140, %c0_141] : memref<1x4x10x10x4xf32, #tpu.memory_space<vmem>>, vector<1x1x8x8x4xf32>
    %128 = vector.shape_cast %127 : vector<1x1x8x8x4xf32> to vector<8x8x4xf32>
    %129 = arith.maximumf %124, %128 : vector<8x8x4xf32>
    %c0_142 = arith.constant 0 : index
    %c0_143 = arith.constant 0 : index
    %c0_144 = arith.constant 0 : index
    %c0_145 = arith.constant 0 : index
    %130 = vector.load %arg5[%c0_142, %c0_143, %c0_144, %c0_145] : memref<1x8x8x8xf32, #tpu.memory_space<vmem>>, vector<1x8x8x4xf32>
    %131 = vector.shape_cast %130 : vector<1x8x8x4xf32> to vector<8x8x4xf32>
    %132 = vector.shape_cast %110 : vector<8x8x4xf32> to vector<1x8x8x4xf32>
    tpu.vector_store %arg5[%c0_142, %c0_143, %c0_144, %c0_145], %132 {strides = array<i32>} : memref<1x8x8x8xf32, #tpu.memory_space<vmem>>, vector<1x8x8x4xf32>,
    %c0_146 = arith.constant 0 : index
    %c0_147 = arith.constant 0 : index
    %c0_148 = arith.constant 0 : index
    %c4 = arith.constant 4 : index
    %133 = vector.load %arg5[%c0_146, %c0_147, %c0_148, %c4] : memref<1x8x8x8xf32, #tpu.memory_space<vmem>>, vector<1x8x8x4xf32>
    %134 = vector.shape_cast %133 : vector<1x8x8x4xf32> to vector<8x8x4xf32>
    %135 = vector.shape_cast %129 : vector<8x8x4xf32> to vector<1x8x8x4xf32>
    tpu.vector_store %arg5[%c0_146, %c0_147, %c0_148, %c4], %135 {strides = array<i32>} : memref<1x8x8x8xf32, #tpu.memory_space<vmem>>, vector<1x8x8x4xf32>,
    %cst_149 = arith.constant dense<0.000000e+00> : vector<4xf32>
    %136 = vector.multi_reduction <add>, %110, %cst_149 [0, 1] : vector<8x8x4xf32> to vector<4xf32>
    %137 = vector.shape_cast %136 : vector<4xf32> to vector<1x4xf32>
    %cst_150 = arith.constant dense<0.000000e+00> : vector<4xf32>
    %138 = vector.multi_reduction <add>, %129, %cst_150 [0, 1] : vector<8x8x4xf32> to vector<4xf32>
    %139 = vector.shape_cast %138 : vector<4xf32> to vector<1x4xf32>
    %140 = arith.mulf %110, %110 : vector<8x8x4xf32>
    %cst_151 = arith.constant dense<0.000000e+00> : vector<4xf32>
    %141 = vector.multi_reduction <add>, %140, %cst_151 [0, 1] : vector<8x8x4xf32> to vector<4xf32>
    %142 = vector.shape_cast %141 : vector<4xf32> to vector<1x4xf32>
    %143 = arith.mulf %129, %129 : vector<8x8x4xf32>
    %cst_152 = arith.constant dense<0.000000e+00> : vector<4xf32>
    %144 = vector.multi_reduction <add>, %143, %cst_152 [0, 1] : vector<8x8x4xf32> to vector<4xf32>
    %145 = vector.shape_cast %144 : vector<4xf32> to vector<1x4xf32>
    %146 = tpu.concatenate %137, %139 in 1 : vector<1x4xf32>, vector<1x4xf32> -> vector<1x8xf32>
    %c0_153 = arith.constant 0 : index
    %c0_154 = arith.constant 0 : index
    %c0_155 = arith.constant 0 : index
    %c0_156 = arith.constant 0 : index
    %147 = vector.load %arg6[%c0_153, %c0_154, %c0_155, %c0_156] : memref<1x1x2x8xf32, #tpu.memory_space<vmem>>, vector<1x1x1x8xf32>
    %148 = vector.shape_cast %147 : vector<1x1x1x8xf32> to vector<1x8xf32>
    %149 = vector.shape_cast %146 : vector<1x8xf32> to vector<1x1x1x8xf32>
    tpu.vector_store %arg6[%c0_153, %c0_154, %c0_155, %c0_156], %149 {strides = array<i32>} : memref<1x1x2x8xf32, #tpu.memory_space<vmem>>, vector<1x1x1x8xf32>,
    %150 = tpu.concatenate %142, %145 in 1 : vector<1x4xf32>, vector<1x4xf32> -> vector<1x8xf32>
    %c0_157 = arith.constant 0 : index
    %c0_158 = arith.constant 0 : index
    %c1_159 = arith.constant 1 : index
    %c0_160 = arith.constant 0 : index
    %151 = vector.load %arg6[%c0_157, %c0_158, %c1_159, %c0_160] : memref<1x1x2x8xf32, #tpu.memory_space<vmem>>, vector<1x1x1x8xf32>
    %152 = vector.shape_cast %151 : vector<1x1x1x8xf32> to vector<1x8xf32>
    %153 = vector.shape_cast %150 : vector<1x8xf32> to vector<1x1x1x8xf32>
    tpu.vector_store %arg6[%c0_157, %c0_158, %c1_159, %c0_160], %153 {strides = array<i32>} : memref<1x1x2x8xf32, #tpu.memory_space<vmem>>, vector<1x1x1x8xf32>,
    return
  }
  func.func @transform_0(%arg0: i32, %arg1: i32) -> (i32, i32, i32, i32, i32) {
    %c0_i32 = arith.constant 0 : i32
    %c0_i32_0 = arith.constant 0 : i32
    %c0_i32_1 = arith.constant 0 : i32
    %c0_i32_2 = arith.constant 0 : i32
    %c0_i32_3 = arith.constant 0 : i32
    return %arg0, %c0_i32, %c0_i32_0, %c0_i32_1, %c0_i32_2 : i32, i32, i32, i32, i32
  }
  func.func @transform_1(%arg0: i32, %arg1: i32) -> (i32, i32) {
    %c0_i32 = arith.constant 0 : i32
    %c0_i32_0 = arith.constant 0 : i32
    %c0_i32_1 = arith.constant 0 : i32
    return %c0_i32, %c0_i32_0 : i32, i32
  }
  func.func @transform_2(%arg0: i32, %arg1: i32) -> (i32, i32) {
    %c0_i32 = arith.constant 0 : i32
    %c0_i32_0 = arith.constant 0 : i32
    %c0_i32_1 = arith.constant 0 : i32
    return %c0_i32, %c0_i32_0 : i32, i32
  }
  func.func @transform_3(%arg0: i32, %arg1: i32) -> (i32, i32, i32, i32) {
    %c0_i32 = arith.constant 0 : i32
    %c0_i32_0 = arith.constant 0 : i32
    %c0_i32_1 = arith.constant 0 : i32
    return %arg0, %arg1, %c0_i32, %c0_i32_0 : i32, i32, i32, i32
  }
  func.func @transform_4(%arg0: i32, %arg1: i32) -> (i32, i32, i32, i32) {
    %c0_i32 = arith.constant 0 : i32
    %c0_i32_0 = arith.constant 0 : i32
    %c0_i32_1 = arith.constant 0 : i32
    return %arg0, %arg1, %c0_i32, %c0_i32_0 : i32, i32, i32, i32
  }
}

</mosaic_0001>

<bundles_post_ra>
// kernel: tpu_custom_call.1
= control target key start
LH: loop header
LB: loop body
LE: loop exit
PB: predicated region body
PF: predicated region fallthrough
CT: control target
= control target key end

     0   :  { %10 = vsyncpa [#allocation3], 0  ;;  %s4081_s0 = inlined_call_operand.vmem [shape: f32[2,4,10,10,4], index: 0, kind: input, shape index: {}]   ;;  %s4082_s1 = inlined_call_operand.vmem [shape: f32[100,4], index: 1, kind: input, shape index: {}]   ;;  %s4083_s2 = inlined_call_operand.vmem [shape: f32[1,4], index: 2, kind: input, shape index: {}]   ;;  %s4084_s3 = inlined_call_operand.hbm [shape: f32[2,8,8,8], index: 3, kind: output, shape index: {0}]   ;;  %s4085_s4 = inlined_call_operand.hbm [shape: f32[2,1,2,8], index: 4, kind: output, shape index: {1}]  }
   0x1   :  { %12 = vsyncpa [#allocation3 + $0x1], 0 }
   0x2   :  { %13 = vsyncpa [#allocation5], 0 }
   0x3   :  { %15 = vsyncpa [#allocation5 + $0x1], 0  ;;  %s2522_s15 = smov 0   ;;  %s2524_s16 = smov 0  }
   0x4   :  { %s2526_s17 = smov 0   ;;  %s2528_s18 = smov 0  }
   0x5   :  { %s2530_s19 = smov 0   ;;  %s2532_s20 = smov 0  }
   0x6 LB: > { %s1971_s21 = sadd.s32 4294967295, %s2476_s20   ;;  %s1972_s22 = sadd.s32 4294967294, %s2476_s20   ;;  %s2476_s20 = sphi %s2532_s20, %s21_s20   ;;  %s2472_s19 = sphi %s2530_s19, %s4252_s19   ;;  %s2468_s18 = sphi %s2528_s18, %s4251_s18   ;;  %s2464_s17 = sphi %s2526_s17, %s4250_s17   ;;  %s2460_s16 = sphi %s2524_s16, %s4249_s16   ;;  %s2456_s15 = sphi %s2522_s15, %s4248_s15  }
   0x7   : > { %s33_s23 = sadd.s32 1, %s2472_s19  ;;  %s110_s24 = sadd.s32 1, %s2464_s17 }
   0x8   : > { %p35_p0 = scmp.ge.s32.totalorder %s33_s23, 2  ;;  %p120_p1 = scmp.ne.s32.totalorder %s2464_s17, %s2460_s16 }
   0x9   : > { %p121_p2 = scmp.eq.s32.totalorder %s1971_s21, 1  ;;  %p126_p3 = scmp.ne.s32.totalorder %s2460_s16, %s2456_s15 }
   0xa   : > { %s4254_s23 = smov (%p35_p0, %s33_s23), 0  ;;  %p127_p5 = scmp.eq.s32.totalorder %s1972_s22, 1 }
   0xb   : > { %p2562_p4 = por %p121_p2, %p120_p1  ;;  %s105_s26 = ssub.s32 %s2472_s19, %s4254_s23 }
   0xc   : > { %p1975_p6 = scmp.ge.s32.totalorder %s2476_s20, 1  ;;  %p108_p7 = scmp.eq.s32.totalorder %s105_s26, 0 }
   0xd   : > { %p2569_p8 = por %p127_p5, %p126_p3  ;;  %p187_p9 = scmp.lt.s32.totalorder %s2476_s20, 3 }
   0xe   : > { %s2575_s28 = scalar_select %p108_p7, %s2464_s17, %s110_s24  }
   0xf   : > { %p188_p10 = pnand %p1975_p6, %p187_p9 }
  0x11   : > { %191 = sbr.rel (%p188_p10) target bundleno = 769 (0x301), region = 32 }
  0x16   : > { %p218_p11 = scmp.lt.s32.totalorder %s2468_s18, 1  ;;  %s4099_s8 = smov 4   ;;  %vm1468_vm0 = vcmask 1043456   ;;  %vm927_vm1 = vcmask 31744   ;;  %vm936_vm2 = vcmask 64512   ;;  %vm954_vm3 = vcmask 130048  }
  0x17   : > { %s4098_s9 = smov 8   ;;  %s2480_s10 = smov 12   ;;  %vm945_vm4 = vcmask 97280   ;;  %vm963_vm5 = vcmask 162816   ;;  %vm972_vm6 = vcmask 195584   ;;  %vm4105_vm7 = vcmask 228352  }
  0x18   : > { %s219_s29 = scalar_select %p218_p11, %s2468_s18, 1  ;;  %vm990_vm8 = vcmask 261120   ;;  %vm999_vm9 = vcmask 293888   ;;  %vm1008_vm10 = vcmask 326656   ;;  %vm1017_vm11 = vcmask 359424  }
  0x19   : > { %s2481_s11 = smov 16   ;;  %s2482_s12 = smov 20   ;;  %vm1026_vm12 = vcmask 392192   ;;  %vm1035_vm13 = vcmask 424960   ;;  %vm1044_vm14 = vcmask 457728   ;;  %vm1053_vm15 = vcmask 490496  }
  0x1a   : > { %s2290_s30 = smul.u32 640, %s219_s29  ;;  %s2483_s13 = smov 24  }
  0x1b   : > { %s2484_s14 = smov 28   ;;  %s2485_s21 = smov 32  }
  0x1c   : > { %s2582_s7 = scalar_lea.vmem %s4081_s0, %s2290_s30  ;;  %s2486_s22 = smov 36  }
  0x1d   : > { %v2585_v0 = vld [vmem:[%s2582_s7 + $0xc0] sm:$0xff]  ;;  %v2592_v2 = vld [vmem:[%s2582_s7 + $0xd0] sm:$0xff]  ;;  %s2487_s24 = smov 40   ;;  %s4103_s26 = smov 44  }
  0x1e   : > { %v1979_v1 = vld [vmem:[%s2582_s7 + $0xa0] sm:$0xff]  ;;  %459 = vrot.lane.b32.xlu1 %v2585_v0, %s4099_s8  ;;  %v2595_v3 = vld [vmem:[%s2582_s7 + $0xb0] sm:$0xff]  ;;  %s2489_s29 = smov 48   ;;  %s2490_s30 = smov 52  }
  0x1f   : > { %455 = vrot.lane.b32.xlu0 %v1979_v1, %s4099_s8  ;;  %v2602_v4 = vld [vmem:[%s2582_s7 + $0xf0] sm:$0xff]  ;;  %v2605_v5 = vld [vmem:[%s2582_s7 + $0xe0] sm:$0xff]  ;;  %s4101_s5 = smov 56   ;;  %s2493_s6 = smov 64  }
  0x20   : > { %v2612_v6 = vld [vmem:[%s2582_s7 + $0x110] sm:$0xff]  ;;  %v2615_v7 = vld [vmem:[%s2582_s7 + $0x100] sm:$0xff] }
  0x21   : > { %v2622_v8 = vld [vmem:[%s2582_s7 + $0x11] sm:$0xff]  ;;  %v245_v9 = vld [vmem:[%s2582_s7 + $0x1] sm:$0xff] }
  0x22   : > { %461 = vrot.lane.b32.xlu1 %v2592_v2, %s4099_s8  ;;  %v2629_v10 = vld [vmem:[%s2582_s7 + $0x31] sm:$0xff]  ;;  %v2632_v11 = vld [vmem:[%s2582_s7 + $0x21] sm:$0xff] }
  0x23   : > { %457 = vrot.lane.b32.xlu0 %v2595_v3, %s4099_s8  ;;  %v2639_v12 = vld [vmem:[%s2582_s7 + $0x51] sm:$0xff]  ;;  %v2642_v13 = vld [vmem:[%s2582_s7 + $0x41] sm:$0xff] }
  0x24   : > { %v2649_v14 = vld [vmem:[%s2582_s7 + $0x71] sm:$0xff]  ;;  %v2652_v15 = vld [vmem:[%s2582_s7 + $0x61] sm:$0xff] }
  0x25   : > { %v2659_v16 = vld [vmem:[%s2582_s7 + $0xb1] sm:$0xff]  ;;  %v1987_v17 = vld [vmem:[%s2582_s7 + $0xa1] sm:$0xff] }
  0x26   : > { %465 = vrot.lane.b32.xlu1 %v2602_v4, %s4099_s8  ;;  %v2666_v18 = vld [vmem:[%s2582_s7 + $0xd1] sm:$0xff]  ;;  %v2669_v19 = vld [vmem:[%s2582_s7 + $0xc1] sm:$0xff] }
  0x27   : > { %463 = vrot.lane.b32.xlu0 %v2605_v5, %s4099_s8  ;;  %v2676_v20 = vld [vmem:[%s2582_s7 + $0xf1] sm:$0xff]  ;;  %v2679_v21 = vld [vmem:[%s2582_s7 + $0xe1] sm:$0xff] }
  0x28   : > { %v2686_v22 = vld [vmem:[%s2582_s7 + $0x111] sm:$0xff]  ;;  %v2689_v23 = vld [vmem:[%s2582_s7 + $0x101] sm:$0xff] }
  0x29   : > { %v2696_v24 = vld [vmem:[%s2582_s7 + $0x161] sm:$0xff]  ;;  %v2699_v25 = vld [vmem:[%s2582_s7 + $0x151] sm:$0xff] }
  0x2a   : > { %469 = vrot.lane.b32.xlu1 %v2612_v6, %s4099_s8  ;;  %v2706_v26 = vld [vmem:[%s2582_s7 + $0x201] sm:$0xff]  ;;  %v2709_v27 = vld [vmem:[%s2582_s7 + $0x1f1] sm:$0xff] }
  0x2b   : > { %467 = vrot.lane.b32.xlu0 %v2615_v7, %s4099_s8  ;;  %v2716_v28 = vld [vmem:[%s2582_s7 + $0x162] sm:$0xff]  ;;  %v2719_v29 = vld [vmem:[%s2582_s7 + $0x152] sm:$0xff] }
  0x2c   : > { %v2726_v30 = vld [vmem:[%s2582_s7 + $0x171] sm:$0xff]  ;;  %v2729_v31 = vld [vmem:[%s2582_s7 + $0x20] sm:$0xff] }
  0x2d   : > { %v2736_v32 = vld [vmem:[%s2582_s7 + $0x30] sm:$0xff]  ;;  %v2746_v34 = vld [vmem:[%s2582_s7 + $0x181] sm:$0xff] }
  0x2e   : > { %489 = vrot.lane.b32.xlu1 %v2622_v8, %s4098_s9  ;;  %v2743_v33 = vld [vmem:[%s2582_s7 + $0x211] sm:$0xff]  ;;  %v2760_v36 = vld [vmem:[%s2582_s7 + $0x221] sm:$0xff] }
  0x2f   : > { %487 = vrot.lane.b32.xlu0 %v245_v9, %s4098_s9  ;;  %v2757_v35 = vld [vmem:[%s2582_s7 + $0x172] sm:$0xff]  ;;  %v2771_v37 = vld [vmem:[%s2582_s7 + $0x40] sm:$0xff] }
  0x30   : > { %v2774_v38 = vld [vmem:[%s2582_s7 + $0x182] sm:$0xff]  ;;  %v2788_v40 = vld [vmem:[%s2582_s7 + $0x50] sm:$0xff] }
  0x31   : > { %v2781_v39 = vld [vmem:[%s2582_s7 + $0x22] sm:$0xff]  ;;  %v2791_v41 = vld [vmem:[%s2582_s7 + $0x191] sm:$0xff] }
  0x32   : > { %493 = vrot.lane.b32.xlu1 %v2629_v10, %s4098_s9  ;;  %v2798_v42 = vld [vmem:[%s2582_s7 + $0x32] sm:$0xff]  ;;  %v2808_v44 = vld [vmem:[%s2582_s7 + $0x1a1] sm:$0xff] }
  0x33   : > { %491 = vrot.lane.b32.xlu0 %v2632_v11, %s4098_s9  ;;  %v2805_v43 = vld [vmem:[%s2582_s7 + $0x231] sm:$0xff]  ;;  %v2822_v46 = vld [vmem:[%s2582_s7 + $0x241] sm:$0xff] }
  0x34   : > { %v2819_v45 = vld [vmem:[%s2582_s7 + $0x192] sm:$0xff]  ;;  %4108 = vst [vmem:[#allocation8_spill] sm:$0xff] %v2822_v46  ;;  %v2833_v47 = vld [vmem:[%s2582_s7 + $0x60] sm:$0xff] }
  0x35   : > { %v2836_v48 = vld [vmem:[%s2582_s7 + $0x1a2] sm:$0xff]  ;;  %v2858_v54 = vld [vmem:[%s2582_s7 + $0x70] sm:$0xff] }
  0x36   : > { %497 = vrot.lane.b32.xlu1 %v2639_v12, %s4098_s9  ;;  %4109 = vst [vmem:[#allocation9_spill] sm:$0xff] %v2836_v48  ;;  %v2847_v51 = vld [vmem:[%s2582_s7 + $0x42] sm:$0xff]  ;;  %4114 = vst [vmem:[#allocation14_spill] sm:$0xff] %v2858_v54  ;;  %v2861_v55 = vld [vmem:[%s2582_s7 + $0x1b1] sm:$0xff] }
  0x37   : > { %495 = vrot.lane.b32.xlu0 %v2642_v13, %s4098_s9  ;;  %4115 = vst [vmem:[#allocation15_spill] sm:$0xff] %v2861_v55  ;;  %v2872_v58 = vld [vmem:[%s2582_s7 + $0x52] sm:$0xff]  ;;  %v2098_v62 = vld [vmem:[%s2582_s7 + $0x1c1] sm:$0xff] }
  0x38   : > { %4118 = vst [vmem:[#allocation18_spill] sm:$0xff] %v2872_v58  ;;  %v2883_v61 = vld [vmem:[%s2582_s7 + $0x251] sm:$0xff] }
  0x39   : > { %4121 = vst [vmem:[#allocation21_spill] sm:$0xff] %v2883_v61 }
  0x3a   : > { %501 = vrot.lane.b32.xlu1 %v2649_v14, %s4098_s9 }
  0x3b   : > { %499 = vrot.lane.b32.xlu0 %v2652_v15, %s4098_s9 }
  0x3e   : > { %521 = vrot.lane.b32.xlu1 %v2659_v16, %s2480_s10 }
  0x3f   : > { %519 = vrot.lane.b32.xlu0 %v1987_v17, %s2480_s10 }
  0x42   : > { %525 = vrot.lane.b32.xlu1 %v2666_v18, %s2480_s10 }
  0x43   : > { %523 = vrot.lane.b32.xlu0 %v2669_v19, %s2480_s10 }
  0x46   : > { %529 = vrot.lane.b32.xlu1 %v2676_v20, %s2480_s10 }
  0x47   : > { %527 = vrot.lane.b32.xlu0 %v2679_v21, %s2480_s10 }
  0x4a   : > { %533 = vrot.lane.b32.xlu1 %v2686_v22, %s2480_s10 }
  0x4b   : > { %531 = vrot.lane.b32.xlu0 %v2689_v23, %s2480_s10 }
  0x4e   : > { %1072 = vrot.lane.b32.xlu1 %v2696_v24, %s4099_s8 }
  0x4f   : > { %1070 = vrot.lane.b32.xlu0 %v2699_v25, %s4099_s8 }
  0x52   : > { %1104 = vrot.lane.b32.xlu1 %v2706_v26, %s4098_s9 }
  0x53   : > { %1102 = vrot.lane.b32.xlu0 %v2709_v27, %s4098_s9 }
  0x56   : > { %1136 = vrot.lane.b32.xlu1 %v2716_v28, %s2480_s10 }
  0x57   : > { %1134 = vrot.lane.b32.xlu0 %v2719_v29, %s2480_s10 }
  0x5a   : > { %1074 = vrot.lane.b32.xlu1 %v2726_v30, %s4099_s8 }
  0x5b   : > { %1166 = vrot.lane.b32.xlu0 %v2729_v31, %s2481_s11 }
  0x5e   : > { %1198 = vrot.lane.b32.xlu1 %v2585_v0, %s2482_s12 }
  0x5f   : > { %1168 = vrot.lane.b32.xlu0 %v2736_v32, %s2481_s11 }
  0x62   : > { %1106 = vrot.lane.b32.xlu1 %v2743_v33, %s4098_s9 }
  0x63   : > { %1076 = vrot.lane.b32.xlu0 %v2746_v34, %s4099_s8 }
  0x66   : > { %1230 = vrot.lane.b32.xlu1 %v2632_v11, %s2483_s13 }
  0x67   : > { %1200 = vrot.lane.b32.xlu0 %v2592_v2, %s2482_s12 }
  0x6a   : > { %1138 = vrot.lane.b32.xlu1 %v2757_v35, %s2480_s10 }
  0x6b   : > { %1108 = vrot.lane.b32.xlu0 %v2760_v36, %s4098_s9 }
  0x6e   : > { %1262 = vrot.lane.b32.xlu1 %v2669_v19, %s2484_s14 }
  0x6f   : > { %1232 = vrot.lane.b32.xlu0 %v2629_v10, %s2483_s13 }
  0x72   : > { %1170 = vrot.lane.b32.xlu1 %v2771_v37, %s2481_s11 }
  0x73   : > { %1140 = vrot.lane.b32.xlu0 %v2774_v38, %s2480_s10 }
  0x76   : > { %1294 = vrot.lane.b32.xlu1 %v2781_v39, %s2485_s21 }
  0x77   : > { %1264 = vrot.lane.b32.xlu0 %v2666_v18, %s2484_s14 }
  0x7a   : > { %1172 = vrot.lane.b32.xlu1 %v2788_v40, %s2481_s11 }
  0x7b   : > { %1078 = vrot.lane.b32.xlu0 %v2791_v41, %s4099_s8 }
  0x7e   : > { %1296 = vrot.lane.b32.xlu1 %v2798_v42, %s2485_s21 }
  0x7f   : > { %1202 = vrot.lane.b32.xlu0 %v2605_v5, %s2482_s12 }
  0x82   : > { %1110 = vrot.lane.b32.xlu1 %v2805_v43, %s4098_s9 }
  0x83   : > { %1080 = vrot.lane.b32.xlu0 %v2808_v44, %s4099_s8 }
  0x86   : > { %1234 = vrot.lane.b32.xlu1 %v2642_v13, %s2483_s13 }
  0x87   : > { %1204 = vrot.lane.b32.xlu0 %v2602_v4, %s2482_s12 }
  0x8a   : > { %1142 = vrot.lane.b32.xlu1 %v2819_v45, %s2480_s10 }
  0x8b   : > { %1112 = vrot.lane.b32.xlu0 %v2822_v46, %s4098_s9  ;;  %v3073_v46 = vld [vmem:[%s2582_s7 + $0x200] sm:$0xff] }
  0x8e   : > { %1266 = vrot.lane.b32.xlu1 %v2679_v21, %s2484_s14 }
  0x8f   : > { %1236 = vrot.lane.b32.xlu0 %v2639_v12, %s2483_s13  ;;  %v2106_v12 = vld [vmem:[%s2582_s7 + $0x261] sm:$0xff] }
  0x90   : > { %v2838_v49 = vpop.permute.xlu1 %459 }
  0x91   : > { %4110 = vst [vmem:[#allocation10_spill] sm:$0xff] %v2838_v49  ;;  %v2840_v50 = vpop.permute.xlu0 %455 }
  0x92   : > { %4111 = vst [vmem:[#allocation11_spill] sm:$0xff] %v2840_v50  ;;  %1174 = vrot.lane.b32.xlu1 %v2833_v47, %s2481_s11  ;;  %v2130_v50 = vld [vmem:[%s2582_s7 + $0x130] sm:$0xff] }
  0x93   : > { %1144 = vrot.lane.b32.xlu0 %v2836_v48, %s2480_s10  ;;  %v2003_v48 = vld [vmem:[%s2582_s7 + $0x1e0] sm:$0xff] }
  0x94   : > { %v2849_v52 = vpop.permute.xlu1 %461 }
  0x95   : > { %4112 = vst [vmem:[#allocation12_spill] sm:$0xff] %v2849_v52  ;;  %v2851_v53 = vpop.permute.xlu0 %457 }
  0x96   : > { %4113 = vst [vmem:[#allocation13_spill] sm:$0xff] %v2851_v53  ;;  %1298 = vrot.lane.b32.xlu1 %v2847_v51, %s2485_s21 }
  0x97   : > { %1268 = vrot.lane.b32.xlu0 %v2676_v20, %s2484_s14 }
  0x98   : > { %v2863_v56 = vpop.permute.xlu1 %465 }
  0x99   : > { %4116 = vst [vmem:[#allocation16_spill] sm:$0xff] %v2863_v56  ;;  %v2865_v57 = vpop.permute.xlu0 %463 }
  0x9a   : > { %4117 = vst [vmem:[#allocation17_spill] sm:$0xff] %v2865_v57  ;;  %1176 = vrot.lane.b32.xlu1 %v2858_v54, %s2481_s11  ;;  %v2988_v57 = vld [vmem:[%s2582_s7 + $0x82] sm:$0xff] }
  0x9b   : > { %1082 = vrot.lane.b32.xlu0 %v2861_v55, %s4099_s8  ;;  %4143 = vst [vmem:[#allocation43_spill] sm:$0xff] %v2988_v57  ;;  %v3095_v55 = vld [vmem:[%s2582_s7 + $0x210] sm:$0xff] }
  0x9c   : > { %v2874_v59 = vpop.permute.xlu1 %469 }
  0x9d   : > { %4119 = vst [vmem:[#allocation19_spill] sm:$0xff] %v2874_v59  ;;  %v2876_v60 = vpop.permute.xlu0 %467  ;;  %v2114_v59 = vld [vmem:[%s2582_s7 + $0x1c2] sm:$0xff] }
  0x9e   : > { %4120 = vst [vmem:[#allocation20_spill] sm:$0xff] %v2876_v60  ;;  %1300 = vrot.lane.b32.xlu1 %v2872_v58, %s2485_s21 }
  0x9f   : > { %1206 = vrot.lane.b32.xlu0 %v2615_v7, %s2482_s12  ;;  %v2902_v7 = vld [vmem:[%s2582_s7 + $0x1b2] sm:$0xff] }
  0xa0   : > { %v2886_v63 = vpop.permute.xlu1 %489  ;;  %4126 = vst [vmem:[#allocation26_spill] sm:$0xff] %v2902_v7 }
  0xa1   : > { %4122 = vst [vmem:[#allocation22_spill] sm:$0xff] %v2886_v63  ;;  %v2888_v1 = vpop.permute.xlu0 %487 }
  0xa2   : > { %4123 = vst [vmem:[#allocation23_spill] sm:$0xff] %v2888_v1  ;;  %1114 = vrot.lane.b32.xlu1 %v2883_v61, %s4098_s9 }
  0xa3   : > { %1084 = vrot.lane.b32.xlu0 %v2098_v62, %s4099_s8  ;;  %s2492_s8 = smov 60  }
  0xa4   : > { %v2893_v4 = vpop.permute.xlu1 %493 }
  0xa5   : > { %4124 = vst [vmem:[#allocation24_spill] sm:$0xff] %v2893_v4  ;;  %v2895_v9 = vpop.permute.xlu0 %491  ;;  %v2011_v4 = vld [vmem:[%s2582_s7 + $0x141] sm:$0xff] }
  0xa6   : > { %4125 = vst [vmem:[#allocation25_spill] sm:$0xff] %v2895_v9  ;;  %1238 = vrot.lane.b32.xlu1 %v2652_v15, %s2483_s13 }
  0xa7   : > { %1208 = vrot.lane.b32.xlu0 %v2612_v6, %s2482_s12  ;;  %v2921_v6 = vld [vmem:[%s2582_s7 + $0x80] sm:$0xff] }
  0xa8   : > { %v2905_v17 = vpop.permute.xlu1 %497  ;;  %4131 = vst [vmem:[#allocation31_spill] sm:$0xff] %v2921_v6 }
  0xa9   : > { %4127 = vst [vmem:[#allocation27_spill] sm:$0xff] %v2905_v17  ;;  %v2907_v20 = vpop.permute.xlu0 %495  ;;  %v2955_v17 = vld [vmem:[%s2582_s7 + $0x72] sm:$0xff] }
  0xaa   : > { %4128 = vst [vmem:[#allocation28_spill] sm:$0xff] %v2907_v20  ;;  %1146 = vrot.lane.b32.xlu1 %v2902_v7, %s2480_s10  ;;  %v2154_v20 = vld [vmem:[%s2582_s7 + $0x92] sm:$0xff] }
  0xab   : > { %1116 = vrot.lane.b32.xlu0 %v2106_v12, %s4098_s9  ;;  %v2998_v7 = vld [vmem:[%s2582_s7 + $0x12] sm:$0xff] }
  0xac   : > { %v2912_v62 = vpop.permute.xlu1 %501 }
  0xad   : > { %4129 = vst [vmem:[#allocation29_spill] sm:$0xff] %v2912_v62  ;;  %v2914_v15 = vpop.permute.xlu0 %499  ;;  %v2932_v62 = vld [vmem:[%s2582_s7 + $0x62] sm:$0xff] }
  0xae   : > { %4130 = vst [vmem:[#allocation30_spill] sm:$0xff] %v2914_v15  ;;  %1270 = vrot.lane.b32.xlu1 %v2689_v23, %s2484_s14  ;;  %v2943_v15 = vld [vmem:[%s2582_s7 + $0x120] sm:$0xff] }
  0xaf   : > { %1240 = vrot.lane.b32.xlu0 %v2649_v14, %s2483_s13  ;;  %4136 = vst [vmem:[#allocation36_spill] sm:$0xff] %v2943_v15 }
  0xb0   : > { %v2924_v60 = vpop.permute.xlu1 %521 }
  0xb1   : > { %4132 = vst [vmem:[#allocation32_spill] sm:$0xff] %v2924_v60  ;;  %v2926_v12 = vpop.permute.xlu0 %519 }
  0xb2   : > { %4133 = vst [vmem:[#allocation33_spill] sm:$0xff] %v2926_v12  ;;  %1178 = vrot.lane.b32.xlu1 %v2921_v6, %s2481_s11  ;;  %v2122_v12 = vld [vmem:[%s2582_s7 + $0x90] sm:$0xff]  ;;  %v2966_v6 = vld [vmem:[%s2582_s7 + $0x81] sm:$0xff] }
  0xb3   : > { %1148 = vrot.lane.b32.xlu0 %v2114_v59, %s2480_s10  ;;  %4141 = vst [vmem:[#allocation41_spill] sm:$0xff] %v2966_v6  ;;  %s2494_s10 = smov [#allocation2]  }
  0xb4   : > { %v2934_v23 = vpop.permute.xlu1 %525 }
  0xb5   : > { %4134 = vst [vmem:[#allocation34_spill] sm:$0xff] %v2934_v23  ;;  %v2936_v14 = vpop.permute.xlu0 %523 }
  0xb6   : > { %4135 = vst [vmem:[#allocation35_spill] sm:$0xff] %v2936_v14  ;;  %1302 = vrot.lane.b32.xlu1 %v2932_v62, %s2485_s21  ;;  %v3009_v14 = vld [vmem:[%s2582_s7 + $0x150] sm:$0xff] }
  0xb7   : > { %1272 = vrot.lane.b32.xlu0 %v2686_v22, %s2484_s14 }
  0xb8   : > { %v2946_v1 = vpop.permute.xlu1 %529 }
  0xb9   : > { %4137 = vst [vmem:[#allocation37_spill] sm:$0xff] %v2946_v1  ;;  %v2948_v59 = vpop.permute.xlu0 %527  ;;  %v2138_v1 = vld [vmem:[%s2582_s7 + $0x91] sm:$0xff] }
  0xba   : > { %4138 = vst [vmem:[#allocation38_spill] sm:$0xff] %v2948_v59  ;;  %1210 = vrot.lane.b32.xlu1 %v2943_v15, %s2482_s12 }
  0xbb   : > { %1180 = vrot.lane.b32.xlu0 %v2122_v12, %s2481_s11 }
  0xbc   : > { %v2957_v56 = vpop.permute.xlu1 %533 }
  0xbd   : > { %4139 = vst [vmem:[#allocation39_spill] sm:$0xff] %v2957_v56  ;;  %v2959_v22 = vpop.permute.xlu0 %531  ;;  %v2146_v56 = vld [vmem:[%s2582_s7 + $0x131] sm:$0xff] }
  0xbe   : > { %4140 = vst [vmem:[#allocation40_spill] sm:$0xff] %v2959_v22  ;;  %1212 = vrot.lane.b32.xlu1 %v2130_v50, %s2482_s12  ;;  %v2977_v22 = vld [vmem:[%s2582_s7 + $0x121] sm:$0xff] }
  0xbf   : > { %1304 = vrot.lane.b32.xlu0 %v2955_v17, %s2485_s21  ;;  %4142 = vst [vmem:[#allocation42_spill] sm:$0xff] %v2977_v22 }
  0xc0   : > { %v2968_v15 = vpop.permute.xlu1 %1072 }
  0xc1   : > { %v2970_v12 = vpop.permute.xlu0 %1070 }
  0xc2   : > { %1244 = vrot.lane.b32.xlu1 %v2138_v1, %s2483_s13 }
  0xc3   : > { %1242 = vrot.lane.b32.xlu0 %v2966_v6, %s2483_s13 }
  0xc4   : > { %v2979_v50 = vpop.permute.xlu1 %1104 }
  0xc5   : > { %v2981_v59 = vpop.permute.xlu0 %1102 }
  0xc6   : > { %1276 = vrot.lane.b32.xlu1 %v2146_v56, %s2484_s14  ;;  %v261_v56 = vld [vmem:[%s2582_s7 + $0x2] sm:$0xff] }
  0xc7   : > { %1274 = vrot.lane.b32.xlu0 %v2977_v22, %s2484_s14 }
  0xc8   : > { %v2990_v1 = vpop.permute.xlu1 %1136 }
  0xc9   : > { %v2992_v6 = vpop.permute.xlu0 %1134 }
  0xca   : > { %1308 = vrot.lane.b32.xlu1 %v2154_v20, %s2485_s21  ;;  %v1995_v20 = vld [vmem:[%s2582_s7 + $0x140] sm:$0xff] }
  0xcb   : > { %1306 = vrot.lane.b32.xlu0 %v2988_v57, %s2485_s21 }
  0xcc   : > { %v3001_v54 = vpop.permute.xlu1 %1074 }
  0xcd   : > { %4144 = vst [vmem:[#allocation44_spill] sm:$0xff] %v3001_v54  ;;  %v3003_v22 = vpop.permute.xlu0 %1166 }
  0xce   : > { %553 = vrot.lane.b32.xlu1 %v2998_v7, %s2481_s11 }
  0xcf   : > { %551 = vrot.lane.b32.xlu0 %v261_v56, %s2481_s11  ;;  %v3025_v56 = vld [vmem:[%s2582_s7 + $0x1f0] sm:$0xff] }
  0xd0   : > { %v3012_v9 = vpop.permute.xlu1 %1198 }
  0xd1   : > { %v3014_v57 = vpop.permute.xlu0 %1168 }
  0xd2   : > { %585 = vrot.lane.b32.xlu1 %v3009_v14, %s2482_s12 }
  0xd3   : > { %583 = vrot.lane.b32.xlu0 %v1995_v20, %s2482_s12  ;;  %v2019_v20 = vld [vmem:[%s2582_s7 + $0x1e1] sm:$0xff] }
  0xd4   : > { %v3020_v49 = vpop.permute.xlu1 %1106 }
  0xd5   : > { %4145 = vst [vmem:[#allocation45_spill] sm:$0xff] %v3020_v49  ;;  %v3022_v23 = vpop.permute.xlu0 %1076 }
  0xd6   : > { %4146 = vst [vmem:[#allocation46_spill] sm:$0xff] %v3022_v23  ;;  %617 = vrot.lane.b32.xlu1 %v3025_v56, %s2483_s13 }
  0xd7   : > { %615 = vrot.lane.b32.xlu0 %v2003_v48, %s2483_s13  ;;  %v3047_v48 = vld [vmem:[%s2582_s7 + $0x160] sm:$0xff] }
  0xd8   : > { %v3031_v52 = vpop.permute.xlu1 %1230 }
  0xd9   : > { %v3033_v61 = vpop.permute.xlu0 %1200 }
  0xda   : > { %555 = vrot.lane.b32.xlu1 %v2781_v39, %s2481_s11 }
  0xdb   : > { %647 = vrot.lane.b32.xlu0 %v2011_v4, %s2484_s14  ;;  %v2027_v4 = vld [vmem:[%s2582_s7 + $0x142] sm:$0xff] }
  0xdc   : > { %v3039_v23 = vpop.permute.xlu1 %1138 }
  0xdd   : > { %4147 = vst [vmem:[#allocation47_spill] sm:$0xff] %v3039_v23  ;;  %v3041_v60 = vpop.permute.xlu0 %1108 }
  0xde   : > { %4148 = vst [vmem:[#allocation48_spill] sm:$0xff] %v3041_v60  ;;  %679 = vrot.lane.b32.xlu1 %v2019_v20, %s2485_s21 }
  0xdf   : > { %649 = vrot.lane.b32.xlu0 %v2699_v25, %s2484_s14  ;;  %v3066_v25 = vld [vmem:[%s2582_s7 + $0x170] sm:$0xff] }
  0xe0   : > { %v3049_v63 = vpop.permute.xlu1 %1262 }
  0xe1   : > { %v3051_v53 = vpop.permute.xlu0 %1232 }
  0xe2   : > { %587 = vrot.lane.b32.xlu1 %v3047_v48, %s2482_s12 }
  0xe3   : > { %557 = vrot.lane.b32.xlu0 %v2798_v42, %s2481_s11 }
  0xe4   : > { %v3058_v60 = vpop.permute.xlu1 %1170 }
  0xe5   : > { %4149 = vst [vmem:[#allocation49_spill] sm:$0xff] %v3058_v60  ;;  %v3060_v20 = vpop.permute.xlu0 %1140  ;;  %v3084_v60 = vld [vmem:[%s2582_s7 + $0x10] sm:$0xff] }
  0xe6   : > { %4150 = vst [vmem:[#allocation50_spill] sm:$0xff] %v3060_v20  ;;  %711 = vrot.lane.b32.xlu1 %v2027_v4, %s2486_s22 }
  0xe7   : > { %681 = vrot.lane.b32.xlu0 %v2709_v27, %s2485_s21 }
  0xe8   : > { %v3068_v23 = vpop.permute.xlu1 %1294 }
  0xe9   : > { %v3070_v49 = vpop.permute.xlu0 %1264 }
  0xea   : > { %619 = vrot.lane.b32.xlu1 %v3073_v46, %s2483_s13 }
  0xeb   : > { %589 = vrot.lane.b32.xlu0 %v3066_v25, %s2482_s12 }
  0xec   : > { %v3079_v20 = vpop.permute.xlu1 %1172 }
  0xed   : > { %4151 = vst [vmem:[#allocation51_spill] sm:$0xff] %v3079_v20  ;;  %v3081_v4 = vpop.permute.xlu0 %1078 }
  0xee   : > { %4152 = vst [vmem:[#allocation52_spill] sm:$0xff] %v3081_v4  ;;  %743 = vrot.lane.b32.xlu1 %v3084_v60, %s2487_s24 }
  0xef   : > { %713 = vrot.lane.b32.xlu0 %v2719_v29, %s2486_s22 }
  0xf0   : > { %v3090_v27 = vpop.permute.xlu1 %1296 }
  0xf1   : > { %v3092_v54 = vpop.permute.xlu0 %1202 }
  0xf2   : > { %4153 = vst [vmem:[#allocation53_spill] sm:$0xff] %v3092_v54  ;;  %651 = vrot.lane.b32.xlu1 %v2696_v24, %s2484_s14 }
  0xf3   : > { %621 = vrot.lane.b32.xlu0 %v3095_v55, %s2483_s13 }
  0xf4   : > { %v3101_v4 = vpop.permute.xlu1 %1110 }
  0xf5   : > { %4154 = vst [vmem:[#allocation54_spill] sm:$0xff] %v3101_v4  ;;  %v3103_v20 = vpop.permute.xlu0 %1080 }
  0xf6   : > { %4155 = vst [vmem:[#allocation55_spill] sm:$0xff] %v3103_v20  ;;  %775 = vrot.lane.b32.xlu1 %v2595_v3, %s4103_s26 }
  0xf7   : > { %745 = vrot.lane.b32.xlu0 %v2729_v31, %s2487_s24 }
  0xf8   : > { %v3109_v29 = vpop.permute.xlu1 %1234 }
  0xf9   : > { %v3111_v54 = vpop.permute.xlu0 %1204 }
  0xfa   : > { %653 = vrot.lane.b32.xlu1 %v2726_v30, %s2484_s14  ;;  %v3134_v30 = vld [vmem:[%s2582_s7 + $0x180] sm:$0xff] }
  0xfb   : > { %559 = vrot.lane.b32.xlu0 %v2847_v51, %s2481_s11 }
  0xfc   : > { %v3117_v24 = vpop.permute.xlu1 %1142 }
  0xfd   : > { %4156 = vst [vmem:[#allocation56_spill] sm:$0xff] %v3117_v24  ;;  %v3119_v20 = vpop.permute.xlu0 %1112 }
  0xfe   : > { %4157 = vst [vmem:[#allocation57_spill] sm:$0xff] %v3119_v20  ;;  %777 = vrot.lane.b32.xlu1 %v2585_v0, %s4103_s26 }
  0xff   : > { %683 = vrot.lane.b32.xlu0 %v2706_v26, %s2485_s21 }
 0x100   : > { %v3125_v3 = vpop.permute.xlu1 %1266 }
 0x101   : > { %v3127_v4 = vpop.permute.xlu0 %1236 }
 0x102   : > { %561 = vrot.lane.b32.xlu1 %v2872_v58, %s2481_s11  ;;  %v3168_v58 = vld [vmem:[%s2582_s7 + $0x220] sm:$0xff] }
 0x103   : > { %807 = vrot.lane.b32.xlu0 %v2622_v8, %s2489_s29  ;;  %v3153_v8 = vld [vmem:[%s2582_s7 + $0x190] sm:$0xff] }
 0x104   : > { %v3136_v20 = vpop.permute.xlu1 %1174 }
 0x105   : > { %4158 = vst [vmem:[#allocation58_spill] sm:$0xff] %v3136_v20  ;;  %v3138_v0 = vpop.permute.xlu0 %1144 }
 0x106   : > { %4159 = vst [vmem:[#allocation59_spill] sm:$0xff] %v3138_v0  ;;  %685 = vrot.lane.b32.xlu1 %v2743_v33, %s2485_s21 }
 0x107   : > { %591 = vrot.lane.b32.xlu0 %v3134_v30, %s2482_s12 }
 0x108   : > { %v3144_v26 = vpop.permute.xlu1 %1298 }
 0x109   : > { %v3146_v24 = vpop.permute.xlu0 %1268 }
 0x10a   : > { %809 = vrot.lane.b32.xlu1 %v2632_v11, %s2489_s29 }
 0x10b   : > { %715 = vrot.lane.b32.xlu0 %v2716_v28, %s2486_s22 }
 0x10c   : > { %v3155_v20 = vpop.permute.xlu1 %1176 }
 0x10d   : > { %4160 = vst [vmem:[#allocation60_spill] sm:$0xff] %v3155_v20  ;;  %v3157_v0 = vpop.permute.xlu0 %1082 }
 0x10e   : > { %4161 = vst [vmem:[#allocation61_spill] sm:$0xff] %v3157_v0  ;;  %593 = vrot.lane.b32.xlu1 %v3153_v8, %s2482_s12 }
 0x10f   : > { %839 = vrot.lane.b32.xlu0 %v2659_v16, %s2490_s30 }
 0x110   : > { %v3163_v33 = vpop.permute.xlu1 %1300 }
 0x111   : > { %v3165_v11 = vpop.permute.xlu0 %1206 }
 0x112   : > { %4162 = vst [vmem:[#allocation62_spill] sm:$0xff] %v3165_v11  ;;  %717 = vrot.lane.b32.xlu1 %v2757_v35, %s2486_s22  ;;  %v3187_v11 = vld [vmem:[%s2582_s7 + $0x230] sm:$0xff] }
 0x113   : > { %623 = vrot.lane.b32.xlu0 %v3168_v58, %s2483_s13 }
 0x114   : > { %v3174_v28 = vpop.permute.xlu1 %1114 }
 0x115   : > { %4163 = vst [vmem:[#allocation63_spill] sm:$0xff] %v3174_v28  ;;  %v3176_v0 = vpop.permute.xlu0 %1084 }
 0x116   : > { %4164 = vst [vmem:[#allocation64_spill] sm:$0xff] %v3176_v0  ;;  %841 = vrot.lane.b32.xlu1 %v2669_v19, %s2490_s30  ;;  %v1435_v19 = vld [vmem:[%s4082_s1 + $0x60] sm:$0xf]  ;;  %v1434_v0 = vld [vmem:[%s4082_s1 + $0x58] sm:$0xff] }
 0x117   : > { %747 = vrot.lane.b32.xlu0 %v2736_v32, %s2487_s24  ;;  %2226 = vmatprep.subr.msk.mxu0 %vm1468_vm0, %v1435_v19 }
 0x118   : > { %v3182_v16 = vpop.permute.xlu1 %1238  ;;  %2264 = vmatprep.subr.msk.mxu1 %vm1468_vm0, %v1435_v19  ;;  %2227 = vmatpush3.msk.msra.mxu0 %vm1468_vm0, %v1435_v19 }
 0x119   : > { %v3184_v20 = vpop.permute.xlu0 %1208  ;;  %2277 = vmatpush3.msk.msra.mxu1 %vm1468_vm0, %v1435_v19  ;;  %2228 = vmatprep.subr.mxu0 %v1434_v0  ;;  %v1432_v19 = vld [vmem:[%s4082_s1 + $0x48] sm:$0xff]  ;;  %vm1414_vm0 = vcmask 523264  }
 0x11a   : > { %4165 = vst [vmem:[#allocation65_spill] sm:$0xff] %v3184_v20  ;;  %625 = vrot.lane.b32.xlu1 %v3187_v11, %s2483_s13  ;;  %2265 = vmatprep.subr.mxu1 %v1434_v0 }
 0x11b   : > { %871 = vrot.lane.b32.xlu0 %v2998_v7, %s4101_s5  ;;  %v1433_v7 = vld [vmem:[%s4082_s1 + $0x50] sm:$0xff]  ;;  %2229 = vmatpush3.msra.mxu0 %v1434_v0 }
 0x11c   : > { %v3196_v35 = vpop.permute.xlu1 %1146  ;;  %2278 = vmatpush3.msra.mxu1 %v1434_v0  ;;  %2230 = vmatprep.subr.mxu0 %v1433_v7  ;;  %v1431_v0 = vld [vmem:[%s4082_s1 + $0x40] sm:$0xff] }
 0x11d   : > { %4166 = vst [vmem:[#allocation66_spill] sm:$0xff] %v3196_v35  ;;  %v3198_v28 = vpop.permute.xlu0 %1116  ;;  %2266 = vmatprep.subr.mxu1 %v1433_v7  ;;  %2231 = vmatpush3.msra.mxu0 %v1433_v7 }
 0x11e   : > { %4167 = vst [vmem:[#allocation67_spill] sm:$0xff] %v3198_v28  ;;  %749 = vrot.lane.b32.xlu1 %v2771_v37, %s2487_s24  ;;  %2279 = vmatpush3.msra.mxu1 %v1433_v7 }
 0x11f   : > { %655 = vrot.lane.b32.xlu0 %v2746_v34, %s2484_s14  ;;  %2232 = vmatprep.subr.mxu0 %v1432_v19 }
 0x120   : > { %v3210_v35 = vpop.permute.xlu1 %1270  ;;  %2267 = vmatprep.subr.mxu1 %v1432_v19  ;;  %2233 = vmatpush3.msra.mxu0 %v1432_v19 }
 0x121   : > { %v3212_v28 = vpop.permute.xlu0 %1240  ;;  %2280 = vmatpush3.msra.mxu1 %v1432_v19  ;;  %2234 = vmatprep.subr.mxu0 %v1431_v0  ;;  %v1429_v19 = vld [vmem:[%s4082_s1 + $0x30] sm:$0xff] }
 0x122   : > { %873 = vrot.lane.b32.xlu1 %v2781_v39, %s4101_s5  ;;  %2268 = vmatprep.subr.mxu1 %v1431_v0 }
 0x123   : > { %779 = vrot.lane.b32.xlu0 %v2592_v2, %s4103_s26  ;;  %v1430_v2 = vld [vmem:[%s4082_s1 + $0x38] sm:$0xff]  ;;  %2235 = vmatpush3.msra.mxu0 %v1431_v0 }
 0x124   : > { %v3221_v34 = vpop.permute.xlu1 %1178  ;;  %2281 = vmatpush3.msra.mxu1 %v1431_v0  ;;  %2236 = vmatprep.subr.mxu0 %v1430_v2 }
 0x125   : > { %4168 = vst [vmem:[#allocation68_spill] sm:$0xff] %v3221_v34  ;;  %v3223_v20 = vpop.permute.xlu0 %1148  ;;  %2269 = vmatprep.subr.mxu1 %v1430_v2  ;;  %2237 = vmatpush3.msra.mxu0 %v1430_v2 }
 0x126   : > { %4169 = vst [vmem:[#allocation69_spill] sm:$0xff] %v3223_v20  ;;  %563 = vrot.lane.b32.xlu1 %v2932_v62, %s2481_s11  ;;  %2282 = vmatpush3.msra.mxu1 %v1430_v2 }
 0x127   : > { %903 = vrot.lane.b32.xlu0 %v3009_v14, %s2492_s8  ;;  %v1318_v14 = vsel %vm927_vm1, %v3025_v56, %v2970_v12  ;;  %2238 = vmatprep.subr.mxu0 %v1429_v19 }
 0x128   : > { %v3235_v39 = vpop.permute.xlu1 %1302  ;;  %v1326_v0 = vsel %vm936_vm2, %v1318_v14, %v2981_v59  ;;  %2270 = vmatprep.subr.mxu1 %v1429_v19  ;;  %2239 = vmatpush3.msra.mxu0 %v1429_v19  ;;  %v1427_v59 = vld [vmem:[%s4082_s1 + $0x20] sm:$0xff] }
 0x129   : > { %v3237_v7 = vpop.permute.xlu0 %1272  ;;  %v1334_v34 = vsel %vm945_vm4, %v1326_v0, %v2992_v6  ;;  %2283 = vmatpush3.msra.mxu1 %v1429_v19  ;;  %v1423_v0 = vld [vmem:[%s4082_s1] sm:$0xff] }
 0x12a   : > { %687 = vrot.lane.b32.xlu1 %v2760_v36, %s2485_s21  ;;  %v1428_v36 = vld [vmem:[%s4082_s1 + $0x28] sm:$0xff] }
 0x12b   : > { %657 = vrot.lane.b32.xlu0 %v2791_v41, %s2484_s14  ;;  %v1342_v41 = vsel %vm954_vm3, %v1334_v34, %v3003_v22  ;;  %2240 = vmatprep.subr.mxu0 %v1428_v36 }
 0x12c   : > { %v3253_v20 = vpop.permute.xlu1 %1210  ;;  %v1350_v6 = vsel %vm963_vm5, %v1342_v41, %v3012_v9  ;;  %2271 = vmatprep.subr.mxu1 %v1428_v36  ;;  %2241 = vmatpush3.msra.mxu0 %v1428_v36 }
 0x12d   : > { %v3255_v12 = vpop.permute.xlu0 %1180  ;;  %v1358_v22 = vsel %vm972_vm6, %v1350_v6, %v3031_v52  ;;  %2284 = vmatpush3.msra.mxu1 %v1428_v36  ;;  %2242 = vmatprep.subr.mxu0 %v1427_v59  ;;  %v3288_v52 = vld [vmem:[%s2582_s7 + $0x1a0] sm:$0xff]  ;;  %v1319_v36 = vsel %vm927_vm1, %v3073_v46, %v2968_v15  ;;  %v3337_v15 = vld [vmem:[%s2582_s7 + $0x1b0] sm:$0xff] }
 0x12e   : > { %811 = vrot.lane.b32.xlu1 %v2629_v10, %s2489_s29  ;;  %v1366_v9 = vsel %vm4105_vm7, %v1358_v22, %v3049_v63  ;;  %v1426_v10 = vld [vmem:[%s4082_s1 + $0x18] sm:$0xff]  ;;  %2272 = vmatprep.subr.mxu1 %v1427_v59  ;;  %v1327_v41 = vsel %vm936_vm2, %v1319_v36, %v2979_v50 }
 0x12f   : > { %781 = vrot.lane.b32.xlu0 %v2605_v5, %s4103_s26  ;;  %v1374_v5 = vsel %vm990_vm8, %v1366_v9, %v3068_v23  ;;  %2243 = vmatpush3.msra.mxu0 %v1427_v59  ;;  %v1425_v23 = vld [vmem:[%s4082_s1 + $0x10] sm:$0xff]  ;;  %v1335_v6 = vsel %vm945_vm4, %v1327_v41, %v2990_v1  ;;  %v4177_v41 = vld [vmem:[#allocation15_spill] sm:$0xff] }
 0x130   : > { %v3275_v56 = vpop.permute.xlu1 %1212  ;;  %2285 = vmatpush3.msra.mxu1 %v1427_v59  ;;  %2244 = vmatprep.subr.mxu0 %v1426_v10 }
 0x131   : > { %v3277_v34 = vpop.permute.xlu0 %1304  ;;  %2273 = vmatprep.subr.mxu1 %v1426_v10  ;;  %2245 = vmatpush3.msra.mxu0 %v1426_v10 }
 0x132   : > { %1390 = vrot.lane.b32.xlu1 %v1374_v5, %s2493_s6  ;;  %2286 = vmatpush3.msra.mxu1 %v1426_v10  ;;  %v3368_v10 = vld [vmem:[%s2582_s7 + $0x250] sm:$0xff] }
 0x133   : > { %905 = vrot.lane.b32.xlu0 %v3047_v48, %s2492_s8  ;;  %v1424_v48 = vld [vmem:[%s4082_s1 + $0x8] sm:$0xff]  ;;  %2246 = vmatprep.subr.mxu0 %v1425_v23 }
 0x134   : > { %v3290_v63 = vpop.permute.xlu1 %1244  ;;  %2274 = vmatprep.subr.mxu1 %v1425_v23  ;;  %2247 = vmatpush3.msra.mxu0 %v1425_v23 }
 0x135   : > { %v3292_v2 = vpop.permute.xlu0 %1242  ;;  %2287 = vmatpush3.msra.mxu1 %v1425_v23  ;;  %2248 = vmatprep.subr.mxu0 %v1424_v48 }
 0x136   : > { %595 = vrot.lane.b32.xlu1 %v3288_v52, %s2482_s12  ;;  %2275 = vmatprep.subr.mxu1 %v1424_v48 }
 0x137   : > { %565 = vrot.lane.b32.xlu0 %v2955_v17, %s2481_s11  ;;  %2249 = vmatpush3.msra.mxu0 %v1424_v48  ;;  %s4173_s11 = smov 56  }
 0x138   : > { %v3304_v19 = vpop.permute.xlu1 %1276  ;;  %2288 = vmatpush3.msra.mxu1 %v1424_v48  ;;  %2250 = vmatprep.subr.mxu0 %v1423_v0 }
 0x139   : > { %v3306_v14 = vpop.permute.xlu0 %1274  ;;  %2276 = vmatprep.subr.mxu1 %v1423_v0  ;;  %2251 = vmatpush3.msra.mxu0 %v1423_v0 }
 0x13a   : > { %719 = vrot.lane.b32.xlu1 %v2774_v38, %s2486_s22  ;;  %v1343_v38 = vsel %vm954_vm3, %v1335_v6, %v3014_v57  ;;  %2289 = vmatpush3.msra.mxu1 %v1423_v0 }
 0x13b   : > { %689 = vrot.lane.b32.xlu0 %v2805_v43, %s2485_s21  ;;  %v1351_v43 = vsel %vm963_vm5, %v1343_v38, %v3033_v61  ;;  %v4178_v38 = vld [vmem:[#allocation44_spill] sm:$0xff] }
 0x13c   : > { %v3322_v59 = vpop.permute.xlu1 %1308  ;;  %v1359_v46 = vsel %vm972_vm6, %v1351_v43, %v3051_v53  ;;  %v3351_v53 = vld [vmem:[%s2582_s7 + $0x240] sm:$0xff]  ;;  %v1320_v43 = vsel %vm927_vm1, %v3095_v55, %v4178_v38  ;;  %v4183_v38 = vld [vmem:[#allocation22_spill] sm:$0xff] }
 0x13d   : > { %v3324_v22 = vpop.permute.xlu0 %1306  ;;  %v1367_v57 = vsel %vm4105_vm7, %v1359_v46, %v3070_v49  ;;  %v4180_v46 = vld [vmem:[#allocation45_spill] sm:$0xff] }
 0x13e   : > { %4170 = vst [vmem:[#allocation70_spill] sm:$0xff] %v3324_v22  ;;  %843 = vrot.lane.b32.xlu1 %v2666_v18, %s2490_s30  ;;  %v1375_v61 = vsel %vm990_vm8, %v1367_v57, %v3090_v27  ;;  %v1328_v57 = vsel %vm936_vm2, %v1320_v43, %v4180_v46  ;;  %v4186_v46 = vld [vmem:[#allocation53_spill] sm:$0xff] }
 0x13f   : > { %813 = vrot.lane.b32.xlu0 %v2642_v13, %s2489_s29 }
 0x140   : > { %v554_v50 = vpop.permute.xlu1 %553 }
 0x141   : > { %v3341_v1 = vpop.permute.xlu0 %551 }
 0x142   : > { %597 = vrot.lane.b32.xlu1 %v3337_v15, %s2482_s12  ;;  %s4175_s12 = smov 44  }
 0x143   : > { %1392 = vrot.lane.b32.xlu0 %v1375_v61, %s2493_s6  ;;  %v3404_v61 = vld [vmem:[%s2582_s7 + $0x51] sm:$0xff] }
 0x144   : > { %v586_v13 = vpop.permute.xlu1 %585 }
 0x145   : > { %v3348_v18 = vpop.permute.xlu0 %583 }
 0x146   : > { %721 = vrot.lane.b32.xlu1 %v2819_v45, %s2486_s22 }
 0x147   : > { %627 = vrot.lane.b32.xlu0 %v3351_v53, %s2483_s13 }
 0x148   : > { %v618_v49 = vpop.permute.xlu1 %617 }
 0x149   : > { %v3357_v9 = vpop.permute.xlu0 %615 }
 0x14a   : > { %4171 = vst [vmem:[#allocation71_spill] sm:$0xff] %v3357_v9  ;;  %845 = vrot.lane.b32.xlu1 %v2679_v21, %s2490_s30  ;;  %v2047_v21 = vld [vmem:[%s2582_s7 + $0xf0] sm:$0xff]  ;;  %v4185_v9 = vld [vmem:[#allocation32_spill] sm:$0xff] }
 0x14b   : > { %751 = vrot.lane.b32.xlu0 %v2788_v40, %s2487_s24 }
 0x14c   : > { %v3363_v27 = vpop.permute.xlu1 %555 }
 0x14d   : > { %v3365_v5 = vpop.permute.xlu0 %647 }
 0x14e   : > { %4172 = vst [vmem:[#allocation72_spill] sm:$0xff] %v3365_v5  ;;  %629 = vrot.lane.b32.xlu1 %v3368_v10, %s2483_s13  ;;  %v4184_v5 = vld [vmem:[#allocation49_spill] sm:$0xff]  ;;  %s3928_s13 = sand.u32 1, %s2460_s16  }
 0x14f   : > { %875 = vrot.lane.b32.xlu0 %v2798_v42, %s4173_s11  ;;  %s1796_s9 = scalar_lea.sflag [#allocation3], %s3928_s13 }
 0x150   : > { %v3374_v45 = vpop.permute.xlu1 %679 }
 0x151   : > { %4174 = vst [vmem:[#allocation73_spill] sm:$0xff] %v3374_v45  ;;  %v650_v23 = vpop.permute.xlu0 %649 }
 0x152   : > { %753 = vrot.lane.b32.xlu1 %v2833_v47, %s2487_s24 }
 0x153   : > { %659 = vrot.lane.b32.xlu0 %v2808_v44, %s2484_s14  ;;  %v2048_v44 = vld [vmem:[%s2582_s7 + $0x100] sm:$0xff] }
 0x154   : > { %v3381_v48 = vpop.permute.xlu1 %587 }
 0x155   : > { %v558_v0 = vpop.permute.xlu0 %557 }
 0x156   : > { %877 = vrot.lane.b32.xlu1 %v2847_v51, %s4173_s11  ;;  %v4179_v51 = vld [vmem:[#allocation8_spill] sm:$0xff] }
 0x157   : > { %783 = vrot.lane.b32.xlu0 %v2047_v21, %s4175_s12  ;;  %v4181_v21 = vld [vmem:[#allocation13_spill] sm:$0xff] }
 0x158   : > { %v3386_v42 = vpop.permute.xlu1 %711 }
 0x159   : > { %4176 = vst [vmem:[#allocation74_spill] sm:$0xff] %v3386_v42  ;;  %v682_v36 = vpop.permute.xlu0 %681 }
 0x15a   : > { %661 = vrot.lane.b32.xlu1 %v4177_v41, %s2484_s14  ;;  %v4182_v41 = vld [vmem:[#allocation47_spill] sm:$0xff]  ;;  %s1976_s14 = sshll.u32 %s3928_s13, 6 }
 0x15b   : > { %907 = vrot.lane.b32.xlu0 %v3066_v25, %s2492_s8  ;;  %v929_v25 = vsel %vm927_vm1, %v3084_v60, %v4181_v21  ;;  %v1336_v42 = vsel %vm945_vm4, %v1328_v57, %v4182_v41  ;;  %v4187_v41 = vld [vmem:[#allocation46_spill] sm:$0xff] }
 0x15c   : > { %v3393_v47 = vpop.permute.xlu1 %619 }
 0x15d   : > { %v590_v6 = vpop.permute.xlu0 %589 }
 0x15e   : > { %785 = vrot.lane.b32.xlu1 %v2048_v44, %s4175_s12  ;;  %v938_v44 = vsel %vm936_vm2, %v929_v25, %v4183_v38  ;;  %v1321_v38 = vsel %vm927_vm1, %v3168_v58, %v4187_v41  ;;  %v4191_v58 = vld [vmem:[#allocation24_spill] sm:$0xff] }
 0x15f   : > { %691 = vrot.lane.b32.xlu0 %v4179_v51, %s2485_s21  ;;  %v1344_v51 = vsel %vm954_vm3, %v1336_v42, %v4184_v5  ;;  %v947_v43 = vsel %vm945_vm4, %v938_v44, %v4185_v9  ;;  %v3448_v44 = vld [vmem:[%s2582_s7 + $0x61] sm:$0xff] }
 0x160   : > { %v3411_v45 = vpop.permute.xlu1 %743  ;;  %v1352_v22 = vsel %vm963_vm5, %v1344_v51, %v4186_v46  ;;  %v956_v57 = vsel %vm954_vm3, %v947_v43, %v554_v50  ;;  %v4192_v51 = vld [vmem:[#allocation50_spill] sm:$0xff] }
 0x161   : > { %v714_v55 = vpop.permute.xlu0 %713  ;;  %v1360_v60 = vsel %vm972_vm6, %v1352_v22, %v3109_v29  ;;  %v965_v9 = vsel %vm963_vm5, %v956_v57, %v586_v13  ;;  %v4188_v22 = vld [vmem:[#allocation21_spill] sm:$0xff]  ;;  %v4190_v13 = vld [vmem:[#allocation48_spill] sm:$0xff]  ;;  %v4193_v57 = vld [vmem:[#allocation34_spill] sm:$0xff] }
 0x162   : > { %909 = vrot.lane.b32.xlu1 %v3134_v30, %s2492_s8  ;;  %v1368_v5 = vsel %vm4105_vm7, %v1360_v60, %v3125_v3  ;;  %v974_v30 = vsel %vm972_vm6, %v965_v9, %v618_v49  ;;  %v4189_v3 = vld [vmem:[#allocation12_spill] sm:$0xff]  ;;  %v4194_v9 = vld [vmem:[#allocation51_spill] sm:$0xff] }
 0x163   : > { %815 = vrot.lane.b32.xlu0 %v3404_v61, %s2489_s29  ;;  %v1376_v25 = vsel %vm990_vm8, %v1368_v5, %v3144_v26  ;;  %v983_v29 = vsel %vm4105_vm7, %v974_v30, %v650_v23  ;;  %v931_v50 = vsel %vm927_vm1, %v2736_v32, %v4189_v3  ;;  %v1329_v26 = vsel %vm936_vm2, %v1321_v38, %v4190_v13  ;;  %v4195_v30 = vld [vmem:[#allocation10_spill] sm:$0xff] }
 0x164   : > { %v652_v42 = vpop.permute.xlu1 %651  ;;  %v992_v49 = vsel %vm990_vm8, %v983_v29, %v682_v36  ;;  %v940_v23 = vsel %vm936_vm2, %v931_v50, %v4191_v58  ;;  %v1337_v43 = vsel %vm945_vm4, %v1329_v26, %v4192_v51  ;;  %v930_v41 = vsel %vm927_vm1, %v2729_v31, %v4195_v30  ;;  %v4196_v29 = vld [vmem:[#allocation9_spill] sm:$0xff]  ;;  %v4198_v26 = vld [vmem:[#allocation35_spill] sm:$0xff] }
 0x165   : > { %v622_v21 = vpop.permute.xlu0 %621  ;;  %v1001_v46 = vsel %vm999_vm9, %v992_v49, %v714_v55  ;;  %v949_v5 = vsel %vm945_vm4, %v940_v23, %v4193_v57  ;;  %v1345_v36 = vsel %vm954_vm3, %v1337_v43, %v4194_v9  ;;  %v3480_v31 = vld [vmem:[%s2582_s7 + $0xf1] sm:$0xff]  ;;  %v3508_v57 = vld [vmem:[%s2582_s7 + $0x101] sm:$0xff] }
 0x166   : > { %693 = vrot.lane.b32.xlu1 %v4188_v22, %s2485_s21  ;;  %v1353_v38 = vsel %vm963_vm5, %v1345_v36, %v3111_v54  ;;  %v958_v55 = vsel %vm954_vm3, %v949_v5, %v558_v0  ;;  %v4197_v22 = vld [vmem:[#allocation25_spill] sm:$0xff] }
 0x167   : > { %1394 = vrot.lane.b32.xlu0 %v1376_v25, %s2493_s6  ;;  %v939_v3 = vsel %vm936_vm2, %v930_v41, %v4197_v22  ;;  %v1361_v50 = vsel %vm972_vm6, %v1353_v38, %v3127_v4  ;;  %v967_v13 = vsel %vm963_vm5, %v958_v55, %v590_v6  ;;  %v4201_v36 = vld [vmem:[#allocation17_spill] sm:$0xff]  ;;  %v4203_v41 = vld [vmem:[#allocation18_spill] sm:$0xff] }
 0x168   : > { %v3455_v60 = vpop.permute.xlu1 %775  ;;  %v948_v54 = vsel %vm945_vm4, %v939_v3, %v4198_v26  ;;  %v1369_v0 = vsel %vm4105_vm7, %v1361_v50, %v3146_v24  ;;  %v976_v49 = vsel %vm972_vm6, %v967_v13, %v622_v21  ;;  %v4204_v38 = vld [vmem:[#allocation38_spill] sm:$0xff]  ;;  %v4205_v26 = vld [vmem:[#allocation31_spill] sm:$0xff] }
 0x169   : > { %v746_v32 = vpop.permute.xlu0 %745  ;;  %v1377_v51 = vsel %vm990_vm8, %v1369_v0, %v3163_v33  ;;  %v957_v4 = vsel %vm954_vm3, %v948_v54, %v3363_v27 }
 0x16a   : > { %v3462_v25 = vsel %vm1008_vm10, %v1001_v46, %v746_v32  ;;  %817 = vrot.lane.b32.xlu1 %v3448_v44, %s2489_s29  ;;  %v966_v43 = vsel %vm963_vm5, %v957_v4, %v3381_v48  ;;  %v4199_v32 = vld [vmem:[#allocation14_spill] sm:$0xff] }
 0x16b   : > { %723 = vrot.lane.b32.xlu0 %v4196_v29, %s2486_s22  ;;  %v975_v24 = vsel %vm972_vm6, %v966_v43, %v3393_v47  ;;  %v4200_v48 = vld [vmem:[#allocation26_spill] sm:$0xff]  ;;  %v932_v47 = vsel %vm927_vm1, %v2771_v37, %v4201_v36 }
 0x16c   : > { %v654_v58 = vpop.permute.xlu1 %653  ;;  %v984_v21 = vsel %vm4105_vm7, %v975_v24, %v652_v42  ;;  %v4202_v42 = vld [vmem:[#allocation28_spill] sm:$0xff]  ;;  %v2049_v29 = vld [vmem:[%s2582_s7 + $0x110] sm:$0xff] }
 0x16d   : > { %v560_v23 = vpop.permute.xlu0 %559  ;;  %v985_v6 = vsel %vm4105_vm7, %v976_v49, %v654_v58  ;;  %v941_v30 = vsel %vm936_vm2, %v932_v47, %v4202_v42  ;;  %v4206_v49 = vld [vmem:[#allocation16_spill] sm:$0xff]  ;;  %v4209_v24 = vld [vmem:[#allocation37_spill] sm:$0xff] }
 0x16e   : > { %1396 = vrot.lane.b32.xlu1 %v1377_v51, %s2493_s6  ;;  %v950_v55 = vsel %vm945_vm4, %v941_v30, %v4204_v38  ;;  %v933_v58 = vsel %vm927_vm1, %v2788_v40, %v4206_v49  ;;  %v4207_v51 = vld [vmem:[#allocation27_spill] sm:$0xff]  ;;  %v4213_v30 = vld [vmem:[#allocation62_spill] sm:$0xff]  ;;  %v4214_v38 = vld [vmem:[#allocation36_spill] sm:$0xff] }
 0x16f   : > { %847 = vrot.lane.b32.xlu0 %v3480_v31, %s2490_s30  ;;  %v959_v22 = vsel %vm954_vm3, %v950_v55, %v560_v23  ;;  %v942_v4 = vsel %vm936_vm2, %v933_v58, %v4207_v51  ;;  %v3583_v58 = vld [vmem:[%s2582_s7 + $0x111] sm:$0xff] }
 0x170   : > { %v3500_v33 = vpop.permute.xlu1 %777 }
 0x171   : > { %v684_v46 = vpop.permute.xlu0 %683 }
 0x172   : > { %v993_v27 = vsel %vm990_vm8, %v984_v21, %v684_v46  ;;  %755 = vrot.lane.b32.xlu1 %v4199_v32, %s2487_s24  ;;  %v951_v21 = vsel %vm945_vm4, %v942_v4, %v4209_v24  ;;  %v4210_v46 = vld [vmem:[#allocation54_spill] sm:$0xff]  ;;  %v4211_v32 = vld [vmem:[#allocation56_spill] sm:$0xff]  ;;  %v4219_v24 = vld [vmem:[#allocation65_spill] sm:$0xff] }
 0x173   : > { %725 = vrot.lane.b32.xlu0 %v4200_v48, %s2486_s22  ;;  %v4218_v4 = vld [vmem:[#allocation60_spill] sm:$0xff] }
 0x174   : > { %v562_v5 = vpop.permute.xlu1 %561 }
 0x175   : > { %v3510_v9 = vpop.permute.xlu0 %807  ;;  %v960_v36 = vsel %vm954_vm3, %v951_v21, %v562_v5  ;;  %v4220_v21 = vld [vmem:[#allocation41_spill] sm:$0xff] }
 0x176   : > { %879 = vrot.lane.b32.xlu1 %v4203_v41, %s4173_s11 }
 0x177   : > { %849 = vrot.lane.b32.xlu0 %v3508_v57, %s2490_s30 }
 0x178   : > { %v686_v3 = vpop.permute.xlu1 %685 }
 0x179   : > { %v592_v50 = vpop.permute.xlu0 %591  ;;  %v994_v37 = vsel %vm990_vm8, %v985_v6, %v686_v3  ;;  %v4208_v6 = vld [vmem:[#allocation52_spill] sm:$0xff] }
 0x17a   : > { %v968_v13 = vsel %vm963_vm5, %v959_v22, %v592_v50  ;;  %787 = vrot.lane.b32.xlu1 %v2049_v29, %s4175_s12  ;;  %v1322_v43 = vsel %vm927_vm1, %v3187_v11, %v4208_v6 }
 0x17b   : > { %757 = vrot.lane.b32.xlu0 %v4205_v26, %s2487_s24  ;;  %v1330_v40 = vsel %vm936_vm2, %v1322_v43, %v4210_v46  ;;  %v227_v46 = vld [vmem:[%s2582_s7] sm:$0xff]  ;;  %s3941_s24 = scalar_lea.vmem [#allocation2], %s1976_s14 }
 0x17c   : > { %v3530_v54 = vpop.permute.xlu1 %809  ;;  %v1338_v48 = vsel %vm945_vm4, %v1330_v40, %v4211_v32  ;;  %v4221_v32 = vld [vmem:[#allocation61_spill] sm:$0xff] }
 0x17d   : > { %v716_v0 = vpop.permute.xlu0 %715 }
 0x17e   : > { %v1002_v23 = vsel %vm999_vm9, %v993_v27, %v716_v0  ;;  %911 = vrot.lane.b32.xlu1 %v3153_v8, %s2492_s8  ;;  %v3550_v27 = vld [vmem:[%s2582_s7 + $0x71] sm:$0xff]  ;;  %v4215_v0 = vld [vmem:[#allocation55_spill] sm:$0xff] }
 0x17f   : > { %881 = vrot.lane.b32.xlu0 %v2932_v62, %s4173_s11  ;;  %v4212_v8 = vld [vmem:[#allocation58_spill] sm:$0xff]  ;;  %v1323_v49 = vsel %vm927_vm1, %v3351_v53, %v4215_v0  ;;  %v2090_v53 = vld [vmem:[%s2582_s7 + $0x260] sm:$0xff] }
 0x180   : > { %v594_v11 = vpop.permute.xlu1 %593  ;;  %v1346_v42 = vsel %vm954_vm3, %v1338_v48, %v4212_v8  ;;  %v1324_v48 = vsel %vm927_vm1, %v3368_v10, %v4221_v32  ;;  %v2173_v32 = vld [vmem:[%s2582_s7 + $0xb1] sm:$0xff] }
 0x181   : > { %v3555_v47 = vpop.permute.xlu0 %839  ;;  %v969_v62 = vsel %vm963_vm5, %v960_v36, %v594_v11  ;;  %v1354_v41 = vsel %vm963_vm5, %v1346_v42, %v4213_v30  ;;  %v4222_v36 = vld [vmem:[#allocation64_spill] sm:$0xff]  ;;  %v4223_v30 = vld [vmem:[#allocation63_spill] sm:$0xff] }
 0x182   : > { %819 = vrot.lane.b32.xlu1 %v3550_v27, %s2489_s29  ;;  %v1362_v5 = vsel %vm972_vm6, %v1354_v41, %v3182_v16  ;;  %v4216_v16 = vld [vmem:[#allocation57_spill] sm:$0xff]  ;;  %v1332_v41 = vsel %vm936_vm2, %v1324_v48, %v4223_v30  ;;  %v1597_v48 = vmax.f32 %v3404_v61, %v3480_v31  ;;  %v2180_v61 = vld [vmem:[%s2582_s7 + $0x121] sm:$0xff] }
 0x183   : > { %789 = vrot.lane.b32.xlu0 %v4214_v38, %s4175_s12  ;;  %v1370_v55 = vsel %vm4105_vm7, %v1362_v5, %v3210_v35  ;;  %v1331_v35 = vsel %vm936_vm2, %v1323_v49, %v4216_v16  ;;  %v4228_v49 = vld [vmem:[#allocation42_spill] sm:$0xff]  ;;  %v4230_v16 = vld [vmem:[#allocation68_spill] sm:$0xff] }
 0x184   : > { %v718_v29 = vpop.permute.xlu1 %717  ;;  %v1378_v3 = vsel %vm990_vm8, %v1370_v55, %v3235_v39  ;;  %v4217_v39 = vld [vmem:[#allocation59_spill] sm:$0xff] }
 0x185   : > { %v624_v22 = vpop.permute.xlu0 %623  ;;  %v1003_v50 = vsel %vm999_vm9, %v994_v37, %v718_v29  ;;  %v1339_v37 = vsel %vm945_vm4, %v1331_v35, %v4217_v39  ;;  %v4225_v55 = vld [vmem:[#allocation11_spill] sm:$0xff]  ;;  %v4226_v29 = vld [vmem:[#allocation66_spill] sm:$0xff] }
 0x186   : > { %v977_v26 = vsel %vm972_vm6, %v968_v13, %v624_v22  ;;  %1398 = vrot.lane.b32.xlu1 %v1378_v3, %s2493_s6  ;;  %v1347_v6 = vsel %vm954_vm3, %v1339_v37, %v4218_v4  ;;  %v1340_v22 = vsel %vm945_vm4, %v1332_v41, %v4226_v29  ;;  %v4227_v3 = vld [vmem:[#allocation69_spill] sm:$0xff]  ;;  %v1598_v41 = vmax.f32 %v3448_v44, %v3508_v57 }
 0x187   : > { %913 = vrot.lane.b32.xlu0 %v3288_v52, %s2492_s8  ;;  %v1355_v52 = vsel %vm963_vm5, %v1347_v6, %v4219_v24  ;;  %v1348_v35 = vsel %vm954_vm3, %v1340_v22, %v4230_v16  ;;  %v2165_v37 = vld [vmem:[%s2582_s7 + $0x11] sm:$0xff]  ;;  %v1599_v57 = vmax.f32 %v3550_v27, %v3583_v58 }
 0x188   : > { %v3587_v51 = vpop.permute.xlu1 %841  ;;  %v1363_v40 = vsel %vm972_vm6, %v1355_v52, %v3212_v28  ;;  %v4224_v28 = vld [vmem:[#allocation67_spill] sm:$0xff]  ;;  %v2167_v4 = vld [vmem:[%s2582_s7 + $0x31] sm:$0xff]  ;;  %v1356_v24 = vsel %vm963_vm5, %v1348_v35, %v3253_v20  ;;  %v1593_v30 = vmax.f32 %v2165_v37, %v2173_v32 }
 0x189   : > { %v748_v13 = vpop.permute.xlu0 %747  ;;  %v1371_v11 = vsel %vm4105_vm7, %v1363_v40, %v3237_v7  ;;  %v928_v7 = vsel %vm927_vm1, %v227_v46, %v4225_v55  ;;  %v4231_v6 = vld [vmem:[#allocation33_spill] sm:$0xff]  ;;  %v2168_v40 = vld [vmem:[%s2582_s7 + $0x41] sm:$0xff]  ;;  %v1364_v44 = vsel %vm972_vm6, %v1356_v24, %v3292_v2 }
 0x18a   : > { %v3593_v43 = vsel %vm1008_vm10, %v1002_v23, %v748_v13  ;;  %851 = vrot.lane.b32.xlu1 %v3583_v58, %s2490_s30  ;;  %v1325_v23 = vsel %vm927_vm1, %v2090_v53, %v4222_v36  ;;  %v1379_v10 = vsel %vm990_vm8, %v1371_v11, %v3277_v34  ;;  %v4229_v34 = vld [vmem:[#allocation23_spill] sm:$0xff]  ;;  %v1372_v16 = vsel %vm4105_vm7, %v1364_v44, %v3306_v14 }
 0x18b   : > { %821 = vrot.lane.b32.xlu0 %v4220_v21, %s2489_s29  ;;  %v1333_v38 = vsel %vm936_vm2, %v1325_v23, %v4224_v28  ;;  %v2166_v13 = vld [vmem:[%s2582_s7 + $0x21] sm:$0xff]  ;;  %s2204_s29 = sshll.u32 %s2468_s18, 10 }
 0x18c   : > { %v626_v8 = vpop.permute.xlu1 %625  ;;  %v1341_v0 = vsel %vm945_vm4, %v1333_v38, %v4227_v3  ;;  %v2082_v20 = vld [vmem:[%s2582_s7 + $0x1c0] sm:$0xff]  ;;  %v2181_v38 = vld [vmem:[%s2582_s7 + $0x151] sm:$0xff]  ;;  %s3992_s5 = scalar_lea.hbm %s4084_s3, %s2204_s29 }
 0x18d   : > { %v3611_v42 = vpop.permute.xlu0 %871  ;;  %v3620_v5 = vsel %vm972_vm6, %v969_v62, %v626_v8  ;;  %v937_v62 = vsel %vm936_vm2, %v928_v7, %v4229_v34  ;;  %v1349_v39 = vsel %vm954_vm3, %v1341_v0, %v3255_v12  ;;  %v2172_v12 = vld [vmem:[%s2582_s7 + $0x81] sm:$0xff]  ;;  %v1609_v29 = vmax.f32 %v1593_v30, %v2181_v38  ;;  %v2187_v34 = vld [vmem:[%s2582_s7 + $0x1b1] sm:$0xff] }
 0x18e   : > { %853 = vrot.lane.b32.xlu1 %v4228_v49, %s2490_s30  ;;  %v946_v53 = vsel %vm945_vm4, %v937_v62, %v4231_v6  ;;  %v1357_v52 = vsel %vm963_vm5, %v1349_v39, %v3275_v56  ;;  %v2174_v11 = vld [vmem:[%s2582_s7 + $0xc1] sm:$0xff]  ;;  %v2175_v56 = vld [vmem:[%s2582_s7 + $0xd1] sm:$0xff]  ;;  %v1600_v0 = vmax.f32 %v2172_v12, %v2180_v61  ;;  %s1816_s30 = sshll.u32 %s3941_s24, 4  ;;  %s3996_s30 = int_to_ptr.vmem [resolvable:$true] %s1816_s30 }
 0x18f   : > { %1400 = vrot.lane.b32.xlu0 %v1379_v10, %s2493_s6  ;;  %v2176_v8 = vld [vmem:[%s2582_s7 + $0xe1] sm:$0xff]  ;;  %v1594_v31 = vmax.f32 %v2166_v13, %v2174_v11  ;;  %v1365_v10 = vsel %vm972_vm6, %v1357_v52, %v3290_v63  ;;  %v2185_v49 = vld [vmem:[%s2582_s7 + $0x191] sm:$0xff]  ;;  %v955_v24 = vsel %vm954_vm3, %v946_v53, %v3341_v1  ;;  %s2370_s26 = scalar_lea.vmem %s3996_s30, 1024 }
 0x190   : > { %v750_v21 = vpop.permute.xlu1 %749  ;;  %v4232_v28 = vld [vmem:[#allocation43_spill] sm:$0xff]  ;;  %v1373_v58 = vsel %vm4105_vm7, %v1365_v10, %v3304_v19  ;;  %v1613_v39 = vmax.f32 %v1597_v48, %v2185_v49  ;;  %v2189_v13 = vld [vmem:[%s2582_s7 + $0x1f1] sm:$0xff]  ;;  %v964_v53 = vsel %vm963_vm5, %v955_v24, %v3348_v18  ;;  %p2371_p12 = scmp.ne.s32.totalorder %s3996_s30, %s2370_s26 }
 0x191   : > { %v656_v46 = vpop.permute.xlu0 %655  ;;  %v3652_v36 = vsel %vm1008_vm10, %v1003_v50, %v750_v21  ;;  %v1595_v50 = vmax.f32 %v2167_v4, %v2175_v56  ;;  %v2182_v55 = vld [vmem:[%s2582_s7 + $0x161] sm:$0xff]  ;;  %v1381_v6 = vsel %vm990_vm8, %v1373_v58, %v3322_v59  ;;  %v2191_v19 = vld [vmem:[%s2582_s7 + $0x211] sm:$0xff]  ;;  %v3701_v52 = vmax.f32 %v1609_v29, %v2189_v13 }
 0x192   : > { %v3655_v23 = vsel %vm4105_vm7, %v977_v26, %v656_v46  ;;  %885 = vrot.lane.b32.xlu1 %v4232_v28, %s4173_s11  ;;  %v1596_v26 = vmax.f32 %v2168_v40, %v2176_v8  ;;  %v2184_v7 = vld [vmem:[%s2582_s7 + $0x181] sm:$0xff]  ;;  %v1610_v62 = vmax.f32 %v1594_v31, %v2182_v55  ;;  %v1615_v21 = vmax.f32 %v1599_v57, %v2187_v34  ;;  %v2193_v46 = vld [vmem:[%s2582_s7 + $0x231] sm:$0xff]  ;;  %p2372_p13 = pnand %p2371_p12, %p2562_p4 }
 0x193   : > { %883 = vrot.lane.b32.xlu0 %v2955_v17, %s4173_s11  ;;  %v2183_v17 = vld [vmem:[%s2582_s7 + $0x171] sm:$0xff]  ;;  %v2186_v63 = vld [vmem:[%s2582_s7 + $0x1a1] sm:$0xff]  ;;  %v3716_v11 = vmax.f32 %v1613_v39, %v2193_v46  ;;  %v1753_v56 = vmul.f32 %v3701_v52, %v3701_v52  ;;  %s2374_s11 = sshll.u32 %s2494_s10, 4  ;;  %s2375_s11 = int_to_ptr.vmem [resolvable:$false] %s2374_s11 }
 0x194   : > { %v3678_v22 = vpop.permute.xlu1 %873  ;;  %v1611_v2 = vmax.f32 %v1595_v50, %v2183_v17  ;;  %v1612_v27 = vmax.f32 %v1596_v26, %v2184_v7  ;;  %v2188_v35 = vld [vmem:[%s2582_s7 + $0x1c1] sm:$0xff]  ;;  %v1614_v37 = vmax.f32 %v1598_v41, %v2186_v63  ;;  %v4233_v8 = vld [vmem:[#allocation70_spill] sm:$0xff]  ;;  %v4236_v57 = vld [vmem:[#allocation73_spill] sm:$0xff]  ;;  %p2373_p0 = pneg %p2372_p13  ;;  %s2376_s12 = scalar_lea.vmem %s2375_s11, 2048 }
 0x195   : > { %v3680_v3 = vpop.permute.xlu0 %779  ;;  %v2190_v4 = vld [vmem:[%s2582_s7 + $0x201] sm:$0xff]  ;;  %v1616_v48 = vmax.f32 %v1600_v0, %v2188_v35  ;;  %v1380_v30 = vsel %vm990_vm8, %v1372_v16, %v4233_v8  ;;  %v1761_v44 = vsel %vm927_vm1, %v1753_v56, 0.0  ;;  %v1757_v7 = vmul.f32 %v3716_v11, %v3716_v11  ;;  %v4237_v0 = vld [vmem:[#allocation74_spill] sm:$0xff]  ;;  %p2377_p1 = scmp.lt.s32.totalorder %s3996_s30, %s2375_s11  ;;  %p2378_p2 = scmp.lt.s32.totalorder %s2376_s12, %s2370_s26 }
 0x196   : > { %917 = vrot.lane.b32.xlu1 %v2082_v20, %s2492_s8  ;;  %v2192_v14 = vld [vmem:[%s2582_s7 + $0x221] sm:$0xff]  ;;  %v3705_v59 = vmax.f32 %v1610_v62, %v2190_v4  ;;  %v3707_v12 = vmax.f32 %v1611_v2, %v2191_v19  ;;  %v2195_v20 = vld [vmem:[%s2582_s7 + $0x251] sm:$0xff]  ;;  %v1703_v4 = vsel %vm927_vm1, %v3701_v52, 0.0 }
 0x197   : > { %915 = vrot.lane.b32.xlu0 %v3337_v15, %s2492_s8  ;;  %v2194_v40 = vld [vmem:[%s2582_s7 + $0x241] sm:$0xff]  ;;  %v3709_v1 = vmax.f32 %v1612_v27, %v2192_v14  ;;  %v3740_v17 = vmax.f32 %v1615_v21, %v2195_v20  ;;  %p2379_p3 = por %p2378_p2, %p2377_p1 }
 0x198   : > { %v3713_v15 = vpop.permute.xlu1 %563  ;;  %v4234_v41 = vld [vmem:[#allocation71_spill] sm:$0xff]  ;;  %v3725_v31 = vmax.f32 %v1614_v37, %v2194_v40  ;;  %v1754_v18 = vmul.f32 %v3705_v59, %v3705_v59  ;;  %v4235_v50 = vld [vmem:[#allocation72_spill] sm:$0xff]  ;;  %v1755_v38 = vmul.f32 %v3707_v12, %v3707_v12  ;;  %v1706_v19 = vsel %vm927_vm1, %v3707_v12, 0.0 }
 0x199   : > { %v904_v32 = vpop.permute.xlu0 %903  ;;  %v973_v28 = vsel %vm972_vm6, %v964_v53, %v4234_v41  ;;  %v2196_v61 = vld [vmem:[%s2582_s7 + $0x261] sm:$0xff]  ;;  %v1756_v10 = vmul.f32 %v3709_v1, %v3709_v1  ;;  %v1708_v40 = vsel %vm927_vm1, %v3709_v1, 0.0  ;;  %p2380_p5 = pnand %p2379_p3, %p2373_p0 }
 0x19a   : > { %v982_v26 = vsel %vm4105_vm7, %v973_v28, %v4235_v50  ;;  %1404 = vrot.lane.b32.xlu1 %v1381_v6, %s2493_s6  ;;  %v1762_v29 = vsel %vm927_vm1, %v1754_v18, 0.0  ;;  %v3747_v62 = vmax.f32 %v1616_v48, %v2196_v61  ;;  %v1764_v27 = vsel %vm927_vm1, %v1755_v38, 0.0  ;;  %v2368_v38 = vld [vmem:[%s2582_s7 + $0x60] sm:$0xff] }
 0x19b   : > { %1402 = vrot.lane.b32.xlu0 %v1380_v30, %s2493_s6  ;;  %v991_v55 = vsel %vm990_vm8, %v982_v26, %v4236_v57  ;;  %v1763_v2 = vadd.f32 %v1762_v29, %v1761_v44  ;;  %v1758_v35 = vmul.f32 %v3725_v31, %v3725_v31  ;;  %v1766_v39 = vsel %vm927_vm1, %v1756_v10, 0.0  ;;  %v4238_v10 = vld [vmem:[#allocation20_spill] sm:$0xff] }
 0x19c   : > { %v1000_v49 = vsel %vm999_vm9, %v991_v55, %v4237_v0  ;;  %v688_v63 = vpop.permute.xlu1 %687  ;;  %v1704_v6 = vsel %vm927_vm1, %v3705_v59, 0.0  ;;  %v1760_v48 = vmul.f32 %v3747_v62, %v3747_v62  ;;  %v1710_v30 = vsel %vm927_vm1, %v3716_v11, 0.0 }
 0x19d   : > { %v658_v34 = vpop.permute.xlu0 %657  ;;  %v995_v58 = vsel %vm990_vm8, %v3655_v23, %v688_v63  ;;  %v1009_v37 = vsel %vm1008_vm10, %v1000_v49, %v3411_v45  ;;  %v1765_v13 = vadd.f32 %v1764_v27, %v1763_v2  ;;  %v1759_v23 = vmul.f32 %v3740_v17, %v3740_v17  ;;  %v4240_v49 = vld [vmem:[#allocation40_spill] sm:$0xff] }
 0x19e   : > { %v987_v16 = vsel %vm4105_vm7, %v3620_v5, %v658_v34  ;;  %v1768_v5 = vsel %vm927_vm1, %v1757_v7, 0.0  ;;  %v1705_v24 = vadd.f32 %v1704_v6, %v1703_v4  ;;  %v1018_v14 = vsel %vm1017_vm11, %v1009_v37, %v3455_v60  ;;  %v4239_v7 = vld [vmem:[#allocation30_spill] sm:$0xff] }
 0x19f   : > { %v1767_v46 = vadd.f32 %v1766_v39, %v1765_v13  ;;  %v1027_v53 = vsel %vm1026_vm12, %v1018_v14, %v3510_v9  ;;  %v1770_v20 = vsel %vm927_vm1, %v1758_v35, 0.0  ;;  %vm1443_vm7 = vcmask 818176  }
 0x1a0   : > { %v3770_v45 = vpop.permute.xlu1 %811  ;;  %v1707_v56 = vadd.f32 %v1706_v19, %v1705_v24  ;;  %v1036_v60 = vsel %vm1035_vm13, %v1027_v53, %v3555_v47  ;;  %v1772_v9 = vsel %vm927_vm1, %v1759_v23, 0.0  ;;  %v1712_v47 = vsel %vm927_vm1, %v3725_v31, 0.0 }
 0x1a1   : > { %v3772_v21 = vpop.permute.xlu0 %781  ;;  %v1769_v8 = vadd.f32 %v1768_v5, %v1767_v46  ;;  %v1045_v41 = vsel %vm1044_vm14, %v1036_v60, %v3611_v42  ;;  %v934_v44 = vsel %vm927_vm1, %v2368_v38, %v4238_v10  ;;  %v1774_v42 = vsel %vm927_vm1, %v1760_v48, 0.0 }
 0x1a2   : > { %v1709_v28 = vadd.f32 %v1708_v40, %v1707_v56  ;;  %v1054_v61 = vsel %vm1053_vm15, %v1045_v41, %v904_v32  ;;  %v943_v29 = vsel %vm936_vm2, %v934_v44, %v4239_v7  ;;  %v1714_v0 = vsel %vm927_vm1, %v3740_v17, 0.0 }
 0x1a3   : > { %v1771_v26 = vadd.f32 %v1770_v20, %v1769_v8  ;;  %v952_v63 = vsel %vm945_vm4, %v943_v29, %v4240_v49  ;;  %v1716_v37 = vsel %vm927_vm1, %v3747_v62, 0.0  ;;  %v1019_v48 = vsel %vm1017_vm11, %v3462_v25, %v3500_v33  ;;  %v2369_v8 = vld [vmem:[%s2582_s7 + $0x70] sm:$0xff]  ;;  %v4243_v25 = vld [vmem:[#allocation39_spill] sm:$0xff]  ;;  %s4244_s7 = smov 4  }
 0x1a4   : > { %v1391_v18 = vpop.permute.xlu1 %1390  ;;  %v1711_v55 = vadd.f32 %v1710_v30, %v1709_v28  ;;  %v961_v2 = vsel %vm954_vm3, %v952_v63, %v3713_v15  ;;  %v4241_v30 = vld [vmem:[#allocation19_spill] sm:$0xff] }
 0x1a5   : > { %v906_v50 = vpop.permute.xlu0 %905  ;;  %v1415_v57 = vsel %vm1414_vm0, %v1054_v61, %v1391_v18  ;;  %v1773_v32 = vadd.f32 %v1772_v9, %v1771_v26  ;;  %v935_v41 = vsel %vm927_vm1, %v2369_v8, %v4241_v30 }
 0x1a6   : > { %2252 = vmatprep.mubr.msk.f32.mxu0 %vm1443_vm7, %v1415_v57  ;;  %v1713_v34 = vadd.f32 %v1712_v47, %v1711_v55 }
 0x1a7   : > { %v1775_v39 = vadd.f32 %v1774_v42, %v1773_v32 }
 0x1a8   : > { %v596_v27 = vpop.permute.xlu1 %595  ;;  %v1715_v4 = vadd.f32 %v1714_v0, %v1713_v34 }
 0x1a9   : > { %v566_v35 = vpop.permute.xlu0 %565  ;;  %v970_v13 = vsel %vm963_vm5, %v961_v2, %v596_v27  ;;  %v1776_v6 = vrot.slane %v1775_v39, 4 }
 0x1aa   : > { %v1717_v23 = vadd.f32 %v1716_v37, %v1715_v4 }
 0x1ab   : > { %v1777_v19 = vadd.f32 %v1776_v6, %v1775_v39 }
 0x1ac   : > { %v720_v5 = vpop.permute.xlu1 %719  ;;  %v1718_v46 = vrot.slane %v1717_v23, 4 }
 0x1ad   : > { %v690_v24 = vpop.permute.xlu0 %689  ;;  %v3809_v14 = vsel %vm999_vm9, %v995_v58, %v720_v5  ;;  %v1778_v40 = vrot.slane %v1777_v19, 2  ;;  %v1028_v58 = vsel %vm1026_vm12, %v1019_v48, %v3530_v54 }
 0x1ae   : > { %v996_v15 = vsel %vm990_vm8, %v987_v16, %v690_v24  ;;  %v1719_v53 = vadd.f32 %v1718_v46, %v1717_v23  ;;  %v4242_v16 = vld [vmem:[#allocation29_spill] sm:$0xff]  ;;  %v1037_v61 = vsel %vm1035_vm13, %v1028_v58, %v3587_v51 }
 0x1af   : > { %v1779_v60 = vadd.f32 %v1778_v40, %v1777_v19  ;;  %v944_v28 = vsel %vm936_vm2, %v935_v41, %v4242_v16  ;;  %v1046_v26 = vsel %vm1044_vm14, %v1037_v61, %v3678_v22  ;;  %vm4245_vm2 = vcmask 228352  }
 0x1b0   : > { %v844_v20 = vpop.permute.xlu1 %843  ;;  %v1720_v9 = vrot.slane %v1719_v53, 2  ;;  %v953_v33 = vsel %vm945_vm4, %v944_v28, %v4243_v25  ;;  %v1055_v38 = vsel %vm1053_vm15, %v1046_v26, %v906_v50  ;;  %vm1673_vm4 = vcmask 64544  }
 0x1b1   : > { %v3815_v56 = vpop.permute.xlu0 %813  ;;  %v1780_v18 = vrot.slane %v1779_v60, 1  ;;  %v962_v10 = vsel %vm954_vm3, %v953_v33, %v566_v35  ;;  %vm4246_vm3 = vmmov %vm4245_vm2 }
 0x1b2   : > { %v1721_v47 = vadd.f32 %v1720_v9, %v1719_v53 }
 0x1b3   : > { %v1781_v57 = vadd.f32 %v1780_v18, %v1779_v60 }
 0x1b4   : > { %v598_v54 = vpop.permute.xlu1 %597  ;;  %v1722_v51 = vrot.slane %v1721_v47, 1 }
 0x1b5   : > { %v1393_v44 = vpop.permute.xlu0 %1392  ;;  %v971_v42 = vsel %vm963_vm5, %v962_v10, %v598_v54  ;;  %1790 = vrot.lane.b32.xlu1 %v1781_v57, %s4244_s7 }
 0x1b6   : > { %v1416_v55 = vsel %vm1414_vm0, %v1055_v38, %v1393_v44  ;;  %v1723_v7 = vadd.f32 %v1722_v51, %v1721_v47 }
 0x1b7   : > { %2253 = vmatmul.mubr.msk.f32.vlgmr.msra.gmra.mxu0 %vm1443_vm7, %v1416_v55 }
 0x1b8   : > { %v722_v29 = vpop.permute.xlu1 %721  ;;  %1783 = vrot.lane.b32.xlu0 %v1723_v7, %s4244_s7 }
 0x1b9   : > { %v628_v22 = vpop.permute.xlu0 %627  ;;  %v3837_v32 = vsel %vm999_vm9, %v996_v15, %v722_v29  ;;  %1651 = vrot.lane.b32.xlu1 %v3705_v59, %s4244_s7 }
 0x1ba   : > { %v3840_v50 = vsel %vm972_vm6, %v970_v13, %v628_v22 }
 0x1bc   : > { %v846_v0 = vpop.permute.xlu1 %845  ;;  %1649 = vrot.lane.b32.xlu0 %v3701_v52, %s4244_s7 }
 0x1bd   : > { %v752_v49 = vpop.permute.xlu0 %751  ;;  %1655 = vrot.lane.b32.xlu1 %v3709_v1, %s4244_s7 }
 0x1be   : > { %v1013_v9 = vsel %vm1008_vm10, %v3809_v14, %v752_v49 }
 0x1c0   : > { %v630_v63 = vpop.permute.xlu1 %629  ;;  %1653 = vrot.lane.b32.xlu0 %v3707_v12, %s4244_s7 }
 0x1c1   : > { %v876_v34 = vpop.permute.xlu0 %875  ;;  %v3850_v2 = vsel %vm972_vm6, %v971_v42, %v630_v63  ;;  %1659 = vrot.lane.b32.xlu1 %v3725_v31, %s4244_s7  ;;  %v1020_v31 = vsel %vm1017_vm11, %v3593_v43, %v3680_v3  ;;  %v1021_v43 = vsel %vm1017_vm11, %v3652_v36, %v3772_v21 }
 0x1c4   : > { %v754_v59 = vpop.permute.xlu1 %753  ;;  %1657 = vrot.lane.b32.xlu0 %v3716_v11, %s4244_s7  ;;  %v1029_v11 = vsel %vm1026_vm12, %v1020_v31, %v3770_v45  ;;  %v1030_v45 = vsel %vm1026_vm12, %v1021_v43, %v3815_v56 }
 0x1c5   : > { %v3856_v27 = vpop.permute.xlu0 %659  ;;  %1663 = vrot.lane.b32.xlu1 %v3747_v62, %s4244_s7  ;;  %v1038_v62 = vsel %vm1035_vm13, %v1029_v11, %v844_v20  ;;  %v1039_v15 = vsel %vm1035_vm13, %v1030_v45, %v846_v0  ;;  %v1014_v14 = vsel %vm1008_vm10, %v3837_v32, %v754_v59 }
 0x1c6   : > { %v1047_v6 = vsel %vm1044_vm14, %v1038_v62, %v876_v34  ;;  %v988_v32 = vsel %vm4245_vm2, %v3840_v50, %v3856_v27 }
 0x1c8   : > { %v878_v52 = vpop.permute.xlu1 %877  ;;  %1661 = vrot.lane.b32.xlu0 %v3740_v17, %s4244_s7 }
 0x1c9   : > { %v784_v1 = vpop.permute.xlu0 %783  ;;  %v1048_v46 = vsel %vm1044_vm14, %v1039_v15, %v878_v52  ;;  %v3938_v15 = vld [vmem:[%s4083_s2] ss:$0 sm:$0xff] }
 0x1ca   : > { %v1022_v16 = vsel %vm1017_vm11, %v1013_v9, %v784_v1 }
 0x1cc   : > { %v662_v35 = vpop.permute.xlu1 %661 }
 0x1cd   : > { %v908_v39 = vpop.permute.xlu0 %907  ;;  %v989_v49 = vsel %vm4246_vm3, %v3850_v2, %v662_v35 }
 0x1ce   : > { %v1056_v23 = vsel %vm1053_vm15, %v1047_v6, %v908_v39 }
 0x1d0   : > { %v786_v12 = vpop.permute.xlu1 %785 }
 0x1d1   : > { %v692_v37 = vpop.permute.xlu0 %691  ;;  %v1023_v54 = vsel %vm1017_vm11, %v1014_v14, %v786_v12 }
 0x1d2   : > { %v997_v59 = vsel %vm990_vm8, %v988_v32, %v692_v37 }
 0x1d4   : > { %v910_v13 = vpop.permute.xlu1 %909 }
 0x1d5   : > { %v816_v4 = vpop.permute.xlu0 %815  ;;  %v1057_v40 = vsel %vm1053_vm15, %v1048_v46, %v910_v13 }
 0x1d6   : > { %v1031_v18 = vsel %vm1026_vm12, %v1022_v16, %v816_v4 }
 0x1d8   : > { %v694_v17 = vpop.permute.xlu1 %693 }
 0x1d9   : > { %v1395_v5 = vpop.permute.xlu0 %1394  ;;  %v998_v52 = vsel %vm990_vm8, %v989_v49, %v694_v17 }
 0x1da   : > { %v1417_v24 = vsel %vm1414_vm0, %v1056_v23, %v1395_v5 }
 0x1db   : > { %2255 = vmatprep.mubr.msk.f32.mxu0 %vm1443_vm7, %v1417_v24 }
 0x1dc   : > { %v818_v3 = vpop.permute.xlu1 %817 }
 0x1dd   : > { %v724_v19 = vpop.permute.xlu0 %723  ;;  %v1032_v42 = vsel %vm1026_vm12, %v1023_v54, %v818_v3 }
 0x1de   : > { %v1006_v1 = vsel %vm999_vm9, %v997_v59, %v724_v19 }
 0x1e0   : > { %v1397_v53 = vpop.permute.xlu1 %1396 }
 0x1e1   : > { %v848_v48 = vpop.permute.xlu0 %847  ;;  %v1418_v20 = vsel %vm1414_vm0, %v1057_v40, %v1397_v53 }
 0x1e2   : > { %2256 = vmatmul.mubr.msk.f32.gmra.mxu0 %vm1443_vm7, %v1418_v20  ;;  %v1040_v25 = vsel %vm1035_vm13, %v1031_v18, %v848_v48 }
 0x1e4   : > { %v756_v60 = vpop.permute.xlu1 %755 }
 0x1e5   : > { %v726_v8 = vpop.permute.xlu0 %725  ;;  %v1015_v12 = vsel %vm1008_vm10, %v1006_v1, %v756_v60 }
 0x1e6   : > { %v1007_v39 = vsel %vm999_vm9, %v998_v52, %v726_v8 }
 0x1e8   : > { %v880_v36 = vpop.permute.xlu1 %879 }
 0x1e9   : > { %v850_v21 = vpop.permute.xlu0 %849  ;;  %v1049_v33 = vsel %vm1044_vm14, %v1040_v25, %v880_v36 }
 0x1ea   : > { %v1041_v55 = vsel %vm1035_vm13, %v1032_v42, %v850_v21 }
 0x1ec   : > { %v788_v30 = vpop.permute.xlu1 %787 }
 0x1ed   : > { %v758_v41 = vpop.permute.xlu0 %757  ;;  %v1024_v13 = vsel %vm1017_vm11, %v1015_v12, %v788_v30 }
 0x1ee   : > { %v1016_v31 = vsel %vm1008_vm10, %v1007_v39, %v758_v41 }
 0x1f0   : > { %v912_v58 = vpop.permute.xlu1 %911 }
 0x1f1   : > { %v882_v56 = vpop.permute.xlu0 %881  ;;  %v1058_v26 = vsel %vm1053_vm15, %v1049_v33, %v912_v58 }
 0x1f2   : > { %v1050_v51 = vsel %vm1044_vm14, %v1041_v55, %v882_v56 }
 0x1f4   : > { %v820_v28 = vpop.permute.xlu1 %819 }
 0x1f5   : > { %v790_v61 = vpop.permute.xlu0 %789  ;;  %v1033_v35 = vsel %vm1026_vm12, %v1024_v13, %v820_v28 }
 0x1f6   : > { %v1025_v50 = vsel %vm1017_vm11, %v1016_v31, %v790_v61 }
 0x1f8   : > { %v1399_v47 = vpop.permute.xlu1 %1398 }
 0x1f9   : > { %v914_v38 = vpop.permute.xlu0 %913  ;;  %v1419_v10 = vsel %vm1414_vm0, %v1058_v26, %v1399_v47 }
 0x1fa   : > { %2258 = vmatprep.mubr.msk.f32.mxu1 %vm1443_vm7, %v1419_v10  ;;  %v1059_v7 = vsel %vm1053_vm15, %v1050_v51, %v914_v38 }
 0x1fc   : > { %v852_v44 = vpop.permute.xlu1 %851 }
 0x1fd   : > { %v822_v57 = vpop.permute.xlu0 %821  ;;  %v1042_v4 = vsel %vm1035_vm13, %v1033_v35, %v852_v44 }
 0x1fe   : > { %v1034_v37 = vsel %vm1026_vm12, %v1025_v50, %v822_v57 }
 0x200   : > { %v854_v29 = vpop.permute.xlu1 %853 }
 0x201   : > { %v1401_v22 = vpop.permute.xlu0 %1400  ;;  %v1043_v11 = vsel %vm1035_vm13, %v1034_v37, %v854_v29 }
 0x202   : > { %v1420_v0 = vsel %vm1414_vm0, %v1059_v7, %v1401_v22 }
 0x203   : > { %2259 = vmatmul.mubr.msk.f32.vlgmr.msra.gmra.mxu1 %vm1443_vm7, %v1420_v0 }
 0x204   : > { %v886_v63 = vpop.permute.xlu1 %885 }
 0x205   : > { %v884_v34 = vpop.permute.xlu0 %883  ;;  %v1052_v62 = vsel %vm1044_vm14, %v1043_v11, %v886_v63 }
 0x206   : > { %v1051_v6 = vsel %vm1044_vm14, %v1042_v4, %v884_v34 }
 0x208   : > { %v918_v27 = vpop.permute.xlu1 %917 }
 0x209   : > { %v916_v2 = vpop.permute.xlu0 %915  ;;  %v1061_v23 = vsel %vm1053_vm15, %v1052_v62, %v918_v27 }
 0x20a   : > { %v1060_v17 = vsel %vm1053_vm15, %v1051_v6, %v916_v2 }
 0x20c   : > { %v1405_v5 = vpop.permute.xlu1 %1404 }
 0x20d   : > { %v1403_v24 = vpop.permute.xlu0 %1402  ;;  %v1422_v43 = vsel %vm1414_vm0, %v1061_v23, %v1405_v5 }
 0x20e   : > { %v1421_v3 = vsel %vm1414_vm0, %v1060_v17, %v1403_v24 }
 0x20f   : > { %2261 = vmatprep.mubr.msk.f32.mxu1 %vm1443_vm7, %v1421_v3 }
 0x210   : > { %2262 = vmatmul.mubr.msk.f32.gmra.mxu1 %vm1443_vm7, %v1422_v43 }
 0x227   : > { %v3930_v19 = vpop.permute.xlu1 %1790 }
 0x22a   : > { %v3933_v45 = vpop.permute.xlu0 %1783 }
 0x22b   : > { %v1652_v53 = vpop.permute.xlu1 %1651 }
 0x22e   : > { %v1650_v8 = vpop.permute.xlu0 %1649 }
 0x22f   : > { %v1656_v61 = vpop.permute.xlu1 %1655 }
 0x232   : > { %v1654_v33 = vpop.permute.xlu0 %1653 }
 0x233   : > { %v1660_v38 = vpop.permute.xlu1 %1659 }
 0x236   : > { %v1658_v44 = vpop.permute.xlu0 %1657 }
 0x237   : > { %v1664_v12 = vpop.permute.xlu1 %1663 }
 0x23a   : > { %v1662_v2 = vpop.permute.xlu0 %1661 }
 0x277   : > { %v2254_v46 = vpop.f32.mrf.mxu0 }
 0x278   : > { %v1544_v40 = vadd.f32 %v2254_v46, %v3938_v15 }
 0x279   : > { %v1538_v48 = vpop.f32.mrf.mxu0 }
 0x27a   : > { %1634 = vst.msk [vmem:[%s3941_s24 + $0x8] sm:$0xff] %vm927_vm1, %v1544_v40  ;;  %v1725_v20 = vmul.f32 %v1544_v40, %v1544_v40  ;;  %v1539_v60 = vadd.f32 %v3938_v15, %v1538_v48  ;;  %v1683_v36 = vsel %vm927_vm1, %v1544_v40, 0.0 }
 0x27b   : > { %1675 = vst.msk [vmem:[%s3941_s24 + $0x8] sm:$0xff] %vm1673_vm4, %v1652_v53 }
 0x27c   : > { %1633 = vst.msk [vmem:[%s3941_s24] sm:$0xff] %vm927_vm1, %v1539_v60  ;;  %v1682_v21 = vsel %vm927_vm1, %v1539_v60, 0.0  ;;  %v1724_v30 = vmul.f32 %v1539_v60, %v1539_v60  ;;  %v1733_v58 = vsel %vm927_vm1, %v1725_v20, 0.0 }
 0x27d   : > { %v1684_v41 = vadd.f32 %v1683_v36, %v1682_v21  ;;  %1674 = vst.msk [vmem:[%s3941_s24] sm:$0xff] %vm1673_vm4, %v1650_v8 }
 0x27e   : > { %v1732_v56 = vsel %vm927_vm1, %v1724_v30, 0.0 }
 0x27f   : > { %v1734_v9 = vadd.f32 %v1733_v58, %v1732_v56 }
 0x2a2   : > { %v2257_v16 = vpop.f32.mrf.mxu0 }
 0x2a3   : > { %v1554_v28 = vadd.f32 %v2257_v16, %v3938_v15 }
 0x2a4   : > { %v1548_v18 = vpop.f32.mrf.mxu0 }
 0x2a5   : > { %1636 = vst.msk [vmem:[%s3941_s24 + $0x18] sm:$0xff] %vm927_vm1, %v1554_v28  ;;  %v1549_v25 = vadd.f32 %v3938_v15, %v1548_v18  ;;  %v1727_v51 = vmul.f32 %v1554_v28, %v1554_v28  ;;  %v1687_v22 = vsel %vm927_vm1, %v1554_v28, 0.0 }
 0x2a6   : > { %1677 = vst.msk [vmem:[%s3941_s24 + $0x18] sm:$0xff] %vm1673_vm4, %v1656_v61 }
 0x2a7   : > { %1635 = vst.msk [vmem:[%s3941_s24 + $0x10] sm:$0xff] %vm927_vm1, %v1549_v25  ;;  %v1726_v10 = vmul.f32 %v1549_v25, %v1549_v25  ;;  %v1685_v57 = vsel %vm927_vm1, %v1549_v25, 0.0  ;;  %v1737_v49 = vsel %vm927_vm1, %v1727_v51, 0.0 }
 0x2a8   : > { %1676 = vst.msk [vmem:[%s3941_s24 + $0x10] sm:$0xff] %vm1673_vm4, %v1654_v33  ;;  %v1686_v55 = vadd.f32 %v1685_v57, %v1684_v41 }
 0x2a9   : > { %v1735_v42 = vsel %vm927_vm1, %v1726_v10, 0.0 }
 0x2aa   : > { %v1736_v29 = vadd.f32 %v1735_v42, %v1734_v9  ;;  %v1688_v32 = vadd.f32 %v1687_v22, %v1686_v55 }
 0x2ac   : > { %v1738_v59 = vadd.f32 %v1737_v49, %v1736_v29 }
 0x2c3   : > { %v2260_v26 = vpop.f32.mrf.mxu1 }
 0x2c4   : > { %v1564_v47 = vadd.f32 %v2260_v26, %v3938_v15 }
 0x2c5   : > { %v1558_v14 = vpop.f32.mrf.mxu1 }
 0x2c6   : > { %1638 = vst.msk [vmem:[%s3941_s24 + $0x28] sm:$0xff] %vm927_vm1, %v1564_v47  ;;  %v1559_v54 = vadd.f32 %v3938_v15, %v1558_v14  ;;  %v1729_v1 = vmul.f32 %v1564_v47, %v1564_v47  ;;  %v1691_v50 = vsel %vm927_vm1, %v1564_v47, 0.0 }
 0x2c7   : > { %1679 = vst.msk [vmem:[%s3941_s24 + $0x28] sm:$0xff] %vm1673_vm4, %v1660_v38 }
 0x2c8   : > { %1637 = vst.msk [vmem:[%s3941_s24 + $0x20] sm:$0xff] %vm927_vm1, %v1559_v54  ;;  %v1728_v7 = vmul.f32 %v1559_v54, %v1559_v54  ;;  %v1689_v0 = vsel %vm927_vm1, %v1559_v54, 0.0  ;;  %v1741_v37 = vsel %vm927_vm1, %v1729_v1, 0.0 }
 0x2c9   : > { %1678 = vst.msk [vmem:[%s3941_s24 + $0x20] sm:$0xff] %vm1673_vm4, %v1658_v44  ;;  %v1690_v34 = vadd.f32 %v1689_v0, %v1688_v32 }
 0x2ca   : > { %v1739_v63 = vsel %vm927_vm1, %v1728_v7, 0.0 }
 0x2cb   : > { %v1740_v31 = vadd.f32 %v1739_v63, %v1738_v59  ;;  %v1692_v35 = vadd.f32 %v1691_v50, %v1690_v34 }
 0x2cd   : > { %v1742_v23 = vadd.f32 %v1741_v37, %v1740_v31 }
 0x2d0   : > { %v2263_v52 = vpop.f32.mrf.mxu1 }
 0x2d1   : > { %v1574_v39 = vadd.f32 %v2263_v52, %v3938_v15 }
 0x2d2   : > { %v1568_v13 = vpop.f32.mrf.mxu1 }
 0x2d3   : > { %1640 = vst.msk [vmem:[%s3941_s24 + $0x38] sm:$0xff] %vm927_vm1, %v1574_v39  ;;  %v1569_v27 = vadd.f32 %v3938_v15, %v1568_v13  ;;  %v1731_v4 = vmul.f32 %v1574_v39, %v1574_v39  ;;  %v1695_v17 = vsel %vm927_vm1, %v1574_v39, 0.0 }
 0x2d4   : > { %1681 = vst.msk [vmem:[%s3941_s24 + $0x38] sm:$0xff] %vm1673_vm4, %v1664_v12 }
 0x2d5   : > { %1639 = vst.msk [vmem:[%s3941_s24 + $0x30] sm:$0xff] %vm927_vm1, %v1569_v27  ;;  %v1693_v11 = vsel %vm927_vm1, %v1569_v27, 0.0  ;;  %v1730_v62 = vmul.f32 %v1569_v27, %v1569_v27 }
 0x2d6   : > { %v1694_v6 = vadd.f32 %v1693_v11, %v1692_v35  ;;  %1680 = vst.msk [vmem:[%s3941_s24 + $0x30] sm:$0xff] %vm1673_vm4, %v1662_v2 }
 0x2d7   : > { %v1743_v5 = vsel %vm927_vm1, %v1730_v62, 0.0 }
 0x2d8   : > { %2383 = shalt.err (!%p2380_p5)
}
 0x2d9   : > { %s2384_s7 = scalar_lea.hbm %s3992_s5, 1024  ;;  %s2388_s22 = scalar_lea.hbm %s4084_s3, 2048 }
 0x2da   : > { %p2385_p6 = scmp.ne.s32.totalorder %s3992_s5, %s2384_s7  ;;  %p2389_p10 = scmp.lt.s32.totalorder %s3992_s5, %s4084_s3 }
 0x2db   : > { %p2390_p11 = scmp.lt.s32.totalorder %s2388_s22, %s2384_s7 }
 0x2dc   : > { %p2386_p7 = pnand %p2385_p6, %p2562_p4 }
 0x2dd   : > { %p2391_p12 = por %p2390_p11, %p2389_p10 }
 0x2de   : > { %p2387_p9 = pneg %p2386_p7 }
 0x2e0   : > { %p2392_p13 = pnand %p2391_p12, %p2387_p9 }
 0x2e2   : > { %2395 = shalt.err (!%p2392_p13)
}
 0x2e3   : > { %s2495_s8 = smov 128   ;;  %s4247_s6 = smov 8   ;;  %v1696_v24 = vadd.f32 %v1695_v17, %v1694_v6  ;;  %v1744_v43 = vadd.f32 %v1743_v5, %v1742_v23  ;;  %v1745_v3 = vsel %vm927_vm1, %v1731_v4, 0.0  ;;  %vm1787_vm5 = vcmask 57344  }
 0x2e4   : > { %2291 = dma.vmem_to_hbm [thread:$0]  (%p2562_p4), %s3996_s30, 1024, %s3992_s5, %s1796_s9, %s2495_s8, %s2495_s8, %s4247_s6  }
 0x2e5   : > { %v1697_v15 = vrot.slane %v1696_v24, 4  ;;  %v1746_v46 = vadd.f32 %v1745_v3, %v1744_v43  ;;  %s1977_s26 = sshll.u32 %s3928_s13, 1  ;;  %s2201_s30 = sshll.u32 %s2468_s18, 5 }
 0x2e6   : > { %s217_s5 = scalar_lea.vmem [#allocation4], %s1977_s26  ;;  %s4038_s12 = scalar_lea.hbm %s4085_s4, %s2201_s30 }
 0x2e7   : > { %v1698_v40 = vadd.f32 %v1697_v15, %v1696_v24  ;;  %v1747_v53 = vrot.slane %v1746_v46, 4  ;;  %s1833_s9 = sshll.u32 %s217_s5, 4  ;;  %s1801_s7 = scalar_lea.sflag [#allocation5], %s3928_s13  ;;  %s1834_s9 = int_to_ptr.vmem [resolvable:$true] %s1833_s9 }
 0x2e8   : > { %s2396_s14 = scalar_lea.vmem %s1834_s9, 32  ;;  %s2496_s18 = smov [#allocation4]  }
 0x2e9   : > { %v1748_v48 = vadd.f32 %v1747_v53, %v1746_v46  ;;  %v1699_v20 = vrot.slane %v1698_v40, 2  ;;  %p2397_p0 = scmp.ne.s32.totalorder %s1834_s9, %s2396_s14  ;;  %s2400_s21 = sshll.u32 %s2496_s18, 4  ;;  %s2401_s21 = int_to_ptr.vmem [resolvable:$false] %s2400_s21 }
 0x2ea   : > { %s2402_s22 = scalar_lea.vmem %s2401_s21, 64  ;;  %p2403_p3 = scmp.lt.s32.totalorder %s1834_s9, %s2401_s21 }
 0x2eb   : > { %v1749_v60 = vrot.slane %v1748_v48, 2  ;;  %v1700_v8 = vadd.f32 %v1699_v20, %v1698_v40  ;;  %p2398_p1 = pnand %p2397_p0, %p2562_p4  ;;  %p2404_p5 = scmp.lt.s32.totalorder %s2402_s22, %s2396_s14 }
 0x2ed   : > { %v1750_v36 = vadd.f32 %v1749_v60, %v1748_v48  ;;  %v1701_v21 = vrot.slane %v1700_v8, 1  ;;  %p2399_p2 = pneg %p2398_p1  ;;  %p2405_p6 = por %p2404_p5, %p2403_p3 }
 0x2ef   : > { %v1751_v30 = vrot.slane %v1750_v36, 1  ;;  %v1702_v41 = vadd.f32 %v1701_v21, %v1700_v8  ;;  %p2406_p7 = pnand %p2405_p6, %p2399_p2 }
 0x2f1   : > { %v1752_v58 = vadd.f32 %v1751_v30, %v1750_v36  ;;  %v1786_v56 = vsel %vm927_vm1, %v1702_v41, %v3933_v45 }
 0x2f2   : > { %1788 = vst.msk [vmem:[%s217_s5] sm:$0x1] %vm1787_vm5, %v1786_v56 }
 0x2f3   : > { %v1793_v9 = vsel %vm927_vm1, %v1752_v58, %v3930_v19 }
 0x2f4   : > { %1794 = vst.msk [vmem:[%s217_s5 + $0x1] sm:$0x1] %vm1787_vm5, %v1793_v9 }
 0x2f5   : > { %2409 = shalt.err (!%p2406_p7)
}
 0x2f6   : > { %s2410_s24 = scalar_lea.hbm %s4038_s12, 32  ;;  %s2414_s8 = scalar_lea.hbm %s4085_s4, 64 }
 0x2f7   : > { %p2411_p9 = scmp.ne.s32.totalorder %s4038_s12, %s2410_s24  ;;  %p2415_p12 = scmp.lt.s32.totalorder %s4038_s12, %s4085_s4 }
 0x2f8   : > { %p2416_p13 = scmp.lt.s32.totalorder %s2414_s8, %s2410_s24 }
 0x2f9   : > { %p2412_p10 = pnand %p2411_p9, %p2562_p4 }
 0x2fa   : > { %p2417_p0 = por %p2416_p13, %p2415_p12 }
 0x2fb   : > { %p2413_p11 = pneg %p2412_p10 }
 0x2fd   : > { %p2418_p1 = pnand %p2417_p0, %p2413_p11 }
 0x2ff   : > { %2421 = shalt.err (!%p2418_p1)
}
 0x300   : > { %2292 = dma.vmem_to_hbm [thread:$0]  (%p2562_p4), %s1834_s9, 32, %s4038_s12, %s1801_s7  }
 0x301 PF: > { %p2302_p2 = scmp.ge.s32.totalorder %s2476_s20, 2  ;;  %s1845_s30 = sand.u32 1, %s2456_s15  }
 0x302   : > { %s1846_s5 = scalar_lea.sflag [#allocation3], %s1845_s30 }
 0x303   : > { %p2296_p3 = pnand %p2302_p2, %p2569_p8 }
 0x305   : > { %p2297_p5 = pneg %p2296_p3 }
 0x307   : > { %2447 = dma.done.wait (%p2297_p5), %s1846_s5, 1024  }
 0x308   : > { %2449 = vsyncadd (%p2297_p5), %s1846_s5, 4294966272  ;;  %s1855_s10 = scalar_lea.sflag [#allocation5], %s1845_s30 }
 0x309   : > { %2451 = dma.done.wait (%p2297_p5), %s1855_s10, 32  }
 0x30a   : > { %2453 = vsyncadd (%p2297_p5), %s1855_s10, 4294967264  ;;  %s21_s20 = sadd.s32 1, %s2476_s20   ;;  %s4248_s15 = smov %s2460_s16 }
 0x30b   : > { %p18_p6 = scmp.ge.s32.totalorder %s21_s20, 4   ;;  %s4249_s16 = smov %s2464_s17 }
 0x30c   : > { %s4250_s17 = smov %s2575_s28  ;;  %s4251_s18 = smov %s2472_s19 }
 0x30d   : > { %s4252_s19 = smov %s4254_s23  ;;  %20 = sbr.rel (!%p18_p6) target bundleno = 6 (0x6), region = 94 }
 0x312   :  { %1860 = vsyncpa [#allocation3], 1 }
 0x313   :  { %1862 = vsyncpa [#allocation3 + $0x1], 1 }
 0x314   :  { %1863 = vsyncpa [#allocation5], 1 }
 0x315   :  { %1865 = vsyncpa [#allocation5 + $0x1], 1 }

</bundles_post_ra>
